<compile_context>
chip_gen: v6e
topology: v6e:2x2x1
jax: 0.10.0
libtpu: 0.0.40
codegen_flags: <defaults>
</compile_context>

<pallas_src>
import functools

import jax
import jax.numpy as jnp
from jax.experimental import pallas as pl
from jax.experimental.pallas import tpu as pltpu

LANE = 128            # all channel / output dims padded to this (lane-dense)
CONV1_COUT = 16
CONV2_COUT = 32
FEAT_DIM = 512        # 32 * 4 * 4  (scaled-down analogue of 512*7*7)
HIDDEN = 128          # scaled-down analogue of 4096


# ---------------------------------------------------------------------------
# Pallas kernels
# ---------------------------------------------------------------------------
def _conv3x3_relu_kernel(x_ref, w_ref, b_ref, o_ref, *, H, W):
    """3x3 conv (padding=1) + bias + ReLU for one image.

    x_ref: (1, (H+2)*W, 3*Cin)  rows = padded_row*W + col, lanes = (kw, ci)
    w_ref: (3, 3*Cin, LANE)     one (3*Cin, Cout_pad) matrix per kh offset
    b_ref: (1, LANE)
    o_ref: (1, H*W, LANE)       rows = h*W + w, lane-dense output
    """
    HW = H * W
    acc = jnp.dot(x_ref[0, pl.ds(0, HW), :], w_ref[0],
                  preferred_element_type=jnp.float32)
    for kh in range(1, 3):
        acc = acc + jnp.dot(x_ref[0, pl.ds(kh * W, HW), :], w_ref[kh],
                            preferred_element_type=jnp.float32)
    o_ref[0] = jnp.maximum(acc + b_ref[...], 0.0)


def _maxpool2x2_kernel(x_ref, o_ref):
    """2x2 / stride-2 max pool for one image, both spatial dims in one pass.

    x_ref: (1, H, W//2, 2*C)   lanes = (w_parity, c): adjacent-W pair on lanes
    o_ref: (1, H//2, W//2, C)
    """
    C = o_ref.shape[-1]
    x = x_ref[0]                                   # (H, Wo, 2C)
    pw = jnp.maximum(x[:, :, :C], x[:, :, C:])     # pool along W (lane halves)
    Ho = pw.shape[0] // 2
    pw = pw.reshape(Ho, 2, pw.shape[1], C)         # leading-dim split (free)
    o_ref[0] = jnp.maximum(pw[:, 0], pw[:, 1])     # pool along H


def _mlp3_kernel(x_ref, w1_ref, b1_ref, w2_ref, b2_ref, w3_ref, b3_ref, o_ref):
    """Fused Linear->ReLU->Linear->ReLU->Linear; intermediates stay in VMEM."""
    h = jnp.dot(x_ref[...], w1_ref[...],
                preferred_element_type=jnp.float32) + b1_ref[...]
    h = jnp.maximum(h, 0.0)
    # nn.Dropout(p=0.5): identity in inference mode
    h = jnp.dot(h, w2_ref[...],
                preferred_element_type=jnp.float32) + b2_ref[...]
    h = jnp.maximum(h, 0.0)
    # nn.Dropout(p=0.5): identity in inference mode
    o_ref[...] = jnp.dot(h, w3_ref[...],
                         preferred_element_type=jnp.float32) + b3_ref[...]


# ---------------------------------------------------------------------------
# Pallas wrappers
# ---------------------------------------------------------------------------
def conv3x3_relu(x_nhwc, w_oihw, bias):
    """nn.Conv2d(Cin, Cout, 3, padding=1) + ReLU.  Returns (B, H*W, LANE)."""
    B, H, W, Cin = x_nhwc.shape
    Cout = w_oihw.shape[0]
    xp = jnp.pad(x_nhwc, ((0, 0), (1, 1), (1, 1), (0, 0)))
    # im2col along W only (3x of a tiny padded input); kh accumulated in-kernel.
    xw = jnp.concatenate([xp[:, :, kw:kw + W, :] for kw in range(3)], axis=-1)
    xw = xw.reshape(B, (H + 2) * W, 3 * Cin)
    # PyTorch (Cout, Cin, kh, kw) -> (kh, kw*Cin + ci, co), zero-pad co to LANE.
    wt = jnp.transpose(w_oihw, (2, 3, 1, 0)).reshape(3, 3 * Cin, Cout)
    wt = jnp.pad(wt, ((0, 0), (0, 0), (0, LANE - Cout)))
    bp = jnp.pad(bias, (0, LANE - Cout)).reshape(1, LANE)

    kernel = functools.partial(_conv3x3_relu_kernel, H=H, W=W)
    return pl.pallas_call(
        kernel,
        out_shape=jax.ShapeDtypeStruct((B, H * W, LANE), jnp.float32),
        grid=(B,),
        in_specs=[
            pl.BlockSpec((1, (H + 2) * W, 3 * Cin), lambda i: (i, 0, 0)),
            pl.BlockSpec((3, 3 * Cin, LANE), lambda i: (0, 0, 0)),
            pl.BlockSpec((1, LANE), lambda i: (0, 0)),
        ],
        out_specs=pl.BlockSpec((1, H * W, LANE), lambda i: (i, 0, 0)),
        compiler_params=pltpu.CompilerParams(
            dimension_semantics=("parallel",)),
    )(xw, wt, bp)


def maxpool2x2(x_flat, H, W):
    """nn.MaxPool2d(2, 2).  x_flat: (B, H*W, C) -> (B, H//2, W//2, C)."""
    B, _, C = x_flat.shape
    Ho, Wo = H // 2, W // 2
    # Free relabel: row h*W+w with lane c  ->  (h, w//2, (w%2)*C + c).
    xr = x_flat.reshape(B, H, Wo, 2 * C)
    return pl.pallas_call(
        _maxpool2x2_kernel,
        out_shape=jax.ShapeDtypeStruct((B, Ho, Wo, C), jnp.float32),
        grid=(B,),
        in_specs=[pl.BlockSpec((1, H, Wo, 2 * C), lambda i: (i, 0, 0, 0))],
        out_specs=pl.BlockSpec((1, Ho, Wo, C), lambda i: (i, 0, 0, 0)),
        compiler_params=pltpu.CompilerParams(
            dimension_semantics=("parallel",)),
    )(xr)


def classifier(feat, prm, n_out):
    """Fused 3-layer MLP head.  feat: (B, FEAT_DIM) -> (B, n_out)."""
    B, _ = feat.shape
    m_pad = ((B + 7) // 8) * 8                       # pad batch to 8 sublanes
    x = jnp.pad(feat, ((0, m_pad - B), (0, 0)))
    w3 = jnp.pad(prm["w3"], ((0, 0), (0, LANE - n_out)))   # lane-dense output
    b3 = jnp.pad(prm["b3"], (0, LANE - n_out)).reshape(1, LANE)
    out = pl.pallas_call(
        _mlp3_kernel,
        out_shape=jax.ShapeDtypeStruct((m_pad, LANE), jnp.float32),
    )(x, prm["w1"], prm["b1"].reshape(1, HIDDEN),
      prm["w2"], prm["b2"].reshape(1, HIDDEN), w3, b3)
    return out[:B, :n_out]


# ---------------------------------------------------------------------------
# Model
# ---------------------------------------------------------------------------
def _xavier(key, shape, fan_in, fan_out):
    bound = (6.0 / (fan_in + fan_out)) ** 0.5
    return jax.random.uniform(key, shape, jnp.float32, -bound, bound)


def init_params(key, num_classes=10):
    ks = jax.random.split(key, 8)
    p = {}
    # features: conv(3->16)+relu, maxpool, conv(16->32)+relu, maxpool
    p["conv1_w"] = _xavier(ks[0], (CONV1_COUT, 3, 3, 3), 3 * 9, CONV1_COUT * 9)
    p["conv1_b"] = jnp.zeros((CONV1_COUT,), jnp.float32)
    p["conv2_w"] = _xavier(ks[1], (CONV2_COUT, CONV1_COUT, 3, 3),
                           CONV1_COUT * 9, CONV2_COUT * 9)
    p["conv2_b"] = jnp.zeros((CONV2_COUT,), jnp.float32)

    def mlp(k, out_dim):
        k1, k2, k3 = jax.random.split(k, 3)
        return {
            "w1": _xavier(k1, (FEAT_DIM, HIDDEN), FEAT_DIM, HIDDEN),
            "b1": jnp.zeros((HIDDEN,), jnp.float32),
            "w2": _xavier(k2, (HIDDEN, HIDDEN), HIDDEN, HIDDEN),
            "b2": jnp.zeros((HIDDEN,), jnp.float32),
            "w3": _xavier(k3, (HIDDEN, out_dim), HIDDEN, out_dim),
            "b3": jnp.zeros((out_dim,), jnp.float32),
        }

    p["cls1"] = mlp(ks[2], num_classes)
    p["cls2"] = mlp(ks[3], num_classes)
    p["cls_class2"] = mlp(ks[4], 2)
    return p


@jax.jit
def _features_and_gate(x_nchw, params):
    """Everything up to (and including) the 2-way gating head, in one jit."""
    x = jnp.transpose(x_nchw, (0, 2, 3, 1)).astype(jnp.float32)   # NCHW->NHWC
    B = x.shape[0]
    c1 = conv3x3_relu(x, params["conv1_w"], params["conv1_b"])     # (B,256,128)
    p1 = maxpool2x2(c1, 16, 16)                                    # (B,8,8,128)
    c2 = conv3x3_relu(p1[..., :CONV1_COUT],
                      params["conv2_w"], params["conv2_b"])        # (B,64,128)
    p2 = maxpool2x2(c2, 8, 8)                                      # (B,4,4,128)
    # torch.flatten(x, start_dim=1) on NCHW => channel-major flatten.
    feat = jnp.transpose(p2[..., :CONV2_COUT], (0, 3, 1, 2)).reshape(B, -1)
    x_class2 = classifier(feat, params["cls_class2"], 2)
    predict_y = jnp.argmax(x_class2, axis=1)
    return feat, x_class2, predict_y


@functools.partial(jax.jit, static_argnums=(2,))
def _head(feat, prm, n_out):
    return classifier(feat, prm, n_out)


def vgg_forward(x_nchw, params, num_classes=10):
    feat, x_class2, predict_y = _features_and_gate(x_nchw, params)
    mark1 = 0
    mark2 = 0
    # Data-dependent eager branch (mirrors PyTorch `if predict_y[0] == 0`);
    # the int() below is the single device->host sync of the forward pass.
    # TODO(synk): could be a lax.cond inside jit if python-int marks / scalar
    # `0` outputs were not part of the required reference semantics.
    if int(predict_y[0]) == 0:
        x_1 = _head(feat, params["cls1"], num_classes)
        mark1 = 1
        x_2 = 0
    else:
        x_2 = _head(feat, params["cls2"], num_classes)
        mark2 = 1
        x_1 = 0
    return x_1, mark1, x_2, mark2, x_class2, predict_y


# TODO(synk): features_1 / features_2 are constructor args never used in the
# PyTorch forward(); they are intentionally omitted here.

if __name__ == "__main__":
    key = jax.random.PRNGKey(0)
    k_param, k_x = jax.random.split(key)
    params = init_params(k_param, num_classes=10)
    x = jax.random.normal(k_x, (2, 3, 16, 16), jnp.float32)   # NCHW input

    x_1, mark1, x_2, mark2, x_class2, predict_y = vgg_forward(x, params)

    jax.block_until_ready(x_class2)
    jax.block_until_ready(predict_y)
    if mark1 == 1:
        jax.block_until_ready(x_1)
    else:
        jax.block_until_ready(x_2)
    print("KERNEL_OK")
</pallas_src>

<mosaic_0001>
module attributes {stable_mosaic.version = 11 : i64} {
  func.func @_conv3x3_relu_kernel(%arg0: i32, %arg1: memref<1x288x9xf32, #tpu.memory_space<vmem>>, %arg2: memref<3x9x128xf32, #tpu.memory_space<vmem>>, %arg3: memref<1x128xf32, #tpu.memory_space<vmem>>, %arg4: memref<1x256x128xf32, #tpu.memory_space<vmem>>) attributes {dimension_semantics = [#tpu.dimension_semantics<parallel>], iteration_bounds = array<i64: 2>, scalar_prefetch = 0 : i64, scratch_operands = 0 : i64, tpu.core_type = #tpu.core_type<tc>, window_params = [{transform_indices = @transform_0, window_bounds = array<i64: 1, 288, 9>}, {pipeline_mode = #tpu.pipeline_mode<synchronous>, transform_indices = @transform_1, window_bounds = array<i64: 3, 9, 128>}, {pipeline_mode = #tpu.pipeline_mode<synchronous>, transform_indices = @transform_2, window_bounds = array<i64: 1, 128>}, {transform_indices = @transform_3, window_bounds = array<i64: 1, 256, 128>}]} {
    %c0 = arith.constant 0 : index
    %c0_0 = arith.constant 0 : index
    %c0_1 = arith.constant 0 : index
    %0 = vector.load %arg1[%c0, %c0_0, %c0_1] : memref<1x288x9xf32, #tpu.memory_space<vmem>>, vector<1x256x9xf32>
    %1 = vector.shape_cast %0 : vector<1x256x9xf32> to vector<256x9xf32>
    %c0_2 = arith.constant 0 : index
    %c0_3 = arith.constant 0 : index
    %c0_4 = arith.constant 0 : index
    %2 = vector.load %arg2[%c0_2, %c0_3, %c0_4] : memref<3x9x128xf32, #tpu.memory_space<vmem>>, vector<1x9x128xf32>
    %3 = vector.shape_cast %2 : vector<1x9x128xf32> to vector<9x128xf32>
    %cst = arith.constant dense<0.000000e+00> : vector<256x128xf32>
    %4 = tpu.matmul %1, %3, %cst {dimension_numbers = #tpu.dot_dimension_numbers<[1], [0], [0], [1], [0, 0, 1, 1], [], []>} : vector<256x9xf32>, vector<9x128xf32>, vector<256x128xf32> -> vector<256x128xf32>
    %c0_5 = arith.constant 0 : index
    %c16 = arith.constant 16 : index
    %c0_6 = arith.constant 0 : index
    %5 = vector.load %arg1[%c0_5, %c16, %c0_6] : memref<1x288x9xf32, #tpu.memory_space<vmem>>, vector<1x256x9xf32>
    %6 = vector.shape_cast %5 : vector<1x256x9xf32> to vector<256x9xf32>
    %c1 = arith.constant 1 : index
    %c0_7 = arith.constant 0 : index
    %c0_8 = arith.constant 0 : index
    %7 = vector.load %arg2[%c1, %c0_7, %c0_8] : memref<3x9x128xf32, #tpu.memory_space<vmem>>, vector<1x9x128xf32>
    %8 = vector.shape_cast %7 : vector<1x9x128xf32> to vector<9x128xf32>
    %cst_9 = arith.constant dense<0.000000e+00> : vector<256x128xf32>
    %9 = tpu.matmul %6, %8, %cst_9 {dimension_numbers = #tpu.dot_dimension_numbers<[1], [0], [0], [1], [0, 0, 1, 1], [], []>} : vector<256x9xf32>, vector<9x128xf32>, vector<256x128xf32> -> vector<256x128xf32>
    %10 = arith.addf %4, %9 : vector<256x128xf32>
    %c0_10 = arith.constant 0 : index
    %c32 = arith.constant 32 : index
    %c0_11 = arith.constant 0 : index
    %11 = vector.load %arg1[%c0_10, %c32, %c0_11] : memref<1x288x9xf32, #tpu.memory_space<vmem>>, vector<1x256x9xf32>
    %12 = vector.shape_cast %11 : vector<1x256x9xf32> to vector<256x9xf32>
    %c2 = arith.constant 2 : index
    %c0_12 = arith.constant 0 : index
    %c0_13 = arith.constant 0 : index
    %13 = vector.load %arg2[%c2, %c0_12, %c0_13] : memref<3x9x128xf32, #tpu.memory_space<vmem>>, vector<1x9x128xf32>
    %14 = vector.shape_cast %13 : vector<1x9x128xf32> to vector<9x128xf32>
    %cst_14 = arith.constant dense<0.000000e+00> : vector<256x128xf32>
    %15 = tpu.matmul %12, %14, %cst_14 {dimension_numbers = #tpu.dot_dimension_numbers<[1], [0], [0], [1], [0, 0, 1, 1], [], []>} : vector<256x9xf32>, vector<9x128xf32>, vector<256x128xf32> -> vector<256x128xf32>
    %16 = arith.addf %10, %15 : vector<256x128xf32>
    %c0_15 = arith.constant 0 : index
    %c0_16 = arith.constant 0 : index
    %17 = vector.load %arg3[%c0_15, %c0_16] : memref<1x128xf32, #tpu.memory_space<vmem>>, vector<1x128xf32>
    %18 = vector.broadcast %17 : vector<1x128xf32> to vector<256x128xf32>
    %19 = arith.addf %16, %18 : vector<256x128xf32>
    %cst_17 = arith.constant 0.000000e+00 : f32
    %20 = vector.broadcast %cst_17 : f32 to vector<256x128xf32>
    %21 = arith.maximumf %19, %20 : vector<256x128xf32>
    %c0_18 = arith.constant 0 : index
    %c0_19 = arith.constant 0 : index
    %c0_20 = arith.constant 0 : index
    %22 = vector.load %arg4[%c0_18, %c0_19, %c0_20] : memref<1x256x128xf32, #tpu.memory_space<vmem>>, vector<1x256x128xf32>
    %23 = vector.shape_cast %22 : vector<1x256x128xf32> to vector<256x128xf32>
    %24 = vector.shape_cast %21 : vector<256x128xf32> to vector<1x256x128xf32>
    tpu.vector_store %arg4[%c0_18, %c0_19, %c0_20], %24 {strides = array<i32>} : memref<1x256x128xf32, #tpu.memory_space<vmem>>, vector<1x256x128xf32>,
    return
  }
  func.func @transform_0(%arg0: i32) -> (i32, i32, i32) {
    %c0_i32 = arith.constant 0 : i32
    %c0_i32_0 = arith.constant 0 : i32
    %c0_i32_1 = arith.constant 0 : i32
    return %arg0, %c0_i32, %c0_i32_0 : i32, i32, i32
  }
  func.func @transform_1(%arg0: i32) -> (i32, i32, i32) {
    %c0_i32 = arith.constant 0 : i32
    %c0_i32_0 = arith.constant 0 : i32
    %c0_i32_1 = arith.constant 0 : i32
    %c0_i32_2 = arith.constant 0 : i32
    return %c0_i32, %c0_i32_0, %c0_i32_1 : i32, i32, i32
  }
  func.func @transform_2(%arg0: i32) -> (i32, i32) {
    %c0_i32 = arith.constant 0 : i32
    %c0_i32_0 = arith.constant 0 : i32
    %c0_i32_1 = arith.constant 0 : i32
    return %c0_i32, %c0_i32_0 : i32, i32
  }
  func.func @transform_3(%arg0: i32) -> (i32, i32, i32) {
    %c0_i32 = arith.constant 0 : i32
    %c0_i32_0 = arith.constant 0 : i32
    %c0_i32_1 = arith.constant 0 : i32
    return %arg0, %c0_i32, %c0_i32_0 : i32, i32, i32
  }
}

module attributes {stable_mosaic.version = 11 : i64} {
  func.func @_maxpool2x2_kernel(%arg0: i32, %arg1: memref<1x16x8x256xf32, #tpu.memory_space<vmem>>, %arg2: memref<1x8x8x128xf32, #tpu.memory_space<vmem>>) attributes {dimension_semantics = [#tpu.dimension_semantics<parallel>], iteration_bounds = array<i64: 2>, scalar_prefetch = 0 : i64, scratch_operands = 0 : i64, tpu.core_type = #tpu.core_type<tc>, window_params = [{transform_indices = @transform_0, window_bounds = array<i64: 1, 16, 8, 256>}, {transform_indices = @transform_1, window_bounds = array<i64: 1, 8, 8, 128>}]} {
    %c0 = arith.constant 0 : index
    %c0_0 = arith.constant 0 : index
    %c0_1 = arith.constant 0 : index
    %c0_2 = arith.constant 0 : index
    %0 = vector.load %arg1[%c0, %c0_0, %c0_1, %c0_2] : memref<1x16x8x256xf32, #tpu.memory_space<vmem>>, vector<1x16x8x256xf32>
    %1 = vector.shape_cast %0 : vector<1x16x8x256xf32> to vector<16x8x256xf32>
    %2 = vector.extract_strided_slice %1 {offsets = [0, 0, 0], sizes = [16, 8, 128], strides = [1, 1, 1]} : vector<16x8x256xf32> to vector<16x8x128xf32>
    %3 = vector.extract_strided_slice %1 {offsets = [0, 0, 128], sizes = [16, 8, 128], strides = [1, 1, 1]} : vector<16x8x256xf32> to vector<16x8x128xf32>
    %4 = arith.maximumf %2, %3 : vector<16x8x128xf32>
    %5 = vector.shape_cast %4 : vector<16x8x128xf32> to vector<8x2x8x128xf32>
    %6 = vector.extract_strided_slice %5 {offsets = [0, 0, 0, 0], sizes = [8, 1, 8, 128], strides = [1, 1, 1, 1]} : vector<8x2x8x128xf32> to vector<8x1x8x128xf32>
    %7 = vector.shape_cast %6 : vector<8x1x8x128xf32> to vector<8x8x128xf32>
    %8 = vector.extract_strided_slice %5 {offsets = [0, 1, 0, 0], sizes = [8, 1, 8, 128], strides = [1, 1, 1, 1]} : vector<8x2x8x128xf32> to vector<8x1x8x128xf32>
    %9 = vector.shape_cast %8 : vector<8x1x8x128xf32> to vector<8x8x128xf32>
    %10 = arith.maximumf %7, %9 : vector<8x8x128xf32>
    %c0_3 = arith.constant 0 : index
    %c0_4 = arith.constant 0 : index
    %c0_5 = arith.constant 0 : index
    %c0_6 = arith.constant 0 : index
    %11 = vector.load %arg2[%c0_3, %c0_4, %c0_5, %c0_6] : memref<1x8x8x128xf32, #tpu.memory_space<vmem>>, vector<1x8x8x128xf32>
    %12 = vector.shape_cast %11 : vector<1x8x8x128xf32> to vector<8x8x128xf32>
    %13 = vector.shape_cast %10 : vector<8x8x128xf32> to vector<1x8x8x128xf32>
    tpu.vector_store %arg2[%c0_3, %c0_4, %c0_5, %c0_6], %13 {strides = array<i32>} : memref<1x8x8x128xf32, #tpu.memory_space<vmem>>, vector<1x8x8x128xf32>,
    return
  }
  func.func @transform_0(%arg0: i32) -> (i32, i32, i32, i32) {
    %c0_i32 = arith.constant 0 : i32
    %c0_i32_0 = arith.constant 0 : i32
    %c0_i32_1 = arith.constant 0 : i32
    %c0_i32_2 = arith.constant 0 : i32
    return %arg0, %c0_i32, %c0_i32_0, %c0_i32_1 : i32, i32, i32, i32
  }
  func.func @transform_1(%arg0: i32) -> (i32, i32, i32, i32) {
    %c0_i32 = arith.constant 0 : i32
    %c0_i32_0 = arith.constant 0 : i32
    %c0_i32_1 = arith.constant 0 : i32
    %c0_i32_2 = arith.constant 0 : i32
    return %arg0, %c0_i32, %c0_i32_0, %c0_i32_1 : i32, i32, i32, i32
  }
}

module attributes {stable_mosaic.version = 11 : i64} {
  func.func @_conv3x3_relu_kernel(%arg0: i32, %arg1: memref<1x80x48xf32, #tpu.memory_space<vmem>>, %arg2: memref<3x48x128xf32, #tpu.memory_space<vmem>>, %arg3: memref<1x128xf32, #tpu.memory_space<vmem>>, %arg4: memref<1x64x128xf32, #tpu.memory_space<vmem>>) attributes {dimension_semantics = [#tpu.dimension_semantics<parallel>], iteration_bounds = array<i64: 2>, scalar_prefetch = 0 : i64, scratch_operands = 0 : i64, tpu.core_type = #tpu.core_type<tc>, window_params = [{transform_indices = @transform_0, window_bounds = array<i64: 1, 80, 48>}, {pipeline_mode = #tpu.pipeline_mode<synchronous>, transform_indices = @transform_1, window_bounds = array<i64: 3, 48, 128>}, {pipeline_mode = #tpu.pipeline_mode<synchronous>, transform_indices = @transform_2, window_bounds = array<i64: 1, 128>}, {transform_indices = @transform_3, window_bounds = array<i64: 1, 64, 128>}]} {
    %c0 = arith.constant 0 : index
    %c0_0 = arith.constant 0 : index
    %c0_1 = arith.constant 0 : index
    %0 = vector.load %arg1[%c0, %c0_0, %c0_1] : memref<1x80x48xf32, #tpu.memory_space<vmem>>, vector<1x64x48xf32>
    %1 = vector.shape_cast %0 : vector<1x64x48xf32> to vector<64x48xf32>
    %c0_2 = arith.constant 0 : index
    %c0_3 = arith.constant 0 : index
    %c0_4 = arith.constant 0 : index
    %2 = vector.load %arg2[%c0_2, %c0_3, %c0_4] : memref<3x48x128xf32, #tpu.memory_space<vmem>>, vector<1x48x128xf32>
    %3 = vector.shape_cast %2 : vector<1x48x128xf32> to vector<48x128xf32>
    %cst = arith.constant dense<0.000000e+00> : vector<64x128xf32>
    %4 = tpu.matmul %1, %3, %cst {dimension_numbers = #tpu.dot_dimension_numbers<[1], [0], [0], [1], [0, 0, 1, 1], [], []>} : vector<64x48xf32>, vector<48x128xf32>, vector<64x128xf32> -> vector<64x128xf32>
    %c0_5 = arith.constant 0 : index
    %c8 = arith.constant 8 : index
    %c0_6 = arith.constant 0 : index
    %5 = vector.load %arg1[%c0_5, %c8, %c0_6] : memref<1x80x48xf32, #tpu.memory_space<vmem>>, vector<1x64x48xf32>
    %6 = vector.shape_cast %5 : vector<1x64x48xf32> to vector<64x48xf32>
    %c1 = arith.constant 1 : index
    %c0_7 = arith.constant 0 : index
    %c0_8 = arith.constant 0 : index
    %7 = vector.load %arg2[%c1, %c0_7, %c0_8] : memref<3x48x128xf32, #tpu.memory_space<vmem>>, vector<1x48x128xf32>
    %8 = vector.shape_cast %7 : vector<1x48x128xf32> to vector<48x128xf32>
    %cst_9 = arith.constant dense<0.000000e+00> : vector<64x128xf32>
    %9 = tpu.matmul %6, %8, %cst_9 {dimension_numbers = #tpu.dot_dimension_numbers<[1], [0], [0], [1], [0, 0, 1, 1], [], []>} : vector<64x48xf32>, vector<48x128xf32>, vector<64x128xf32> -> vector<64x128xf32>
    %10 = arith.addf %4, %9 : vector<64x128xf32>
    %c0_10 = arith.constant 0 : index
    %c16 = arith.constant 16 : index
    %c0_11 = arith.constant 0 : index
    %11 = vector.load %arg1[%c0_10, %c16, %c0_11] : memref<1x80x48xf32, #tpu.memory_space<vmem>>, vector<1x64x48xf32>
    %12 = vector.shape_cast %11 : vector<1x64x48xf32> to vector<64x48xf32>
    %c2 = arith.constant 2 : index
    %c0_12 = arith.constant 0 : index
    %c0_13 = arith.constant 0 : index
    %13 = vector.load %arg2[%c2, %c0_12, %c0_13] : memref<3x48x128xf32, #tpu.memory_space<vmem>>, vector<1x48x128xf32>
    %14 = vector.shape_cast %13 : vector<1x48x128xf32> to vector<48x128xf32>
    %cst_14 = arith.constant dense<0.000000e+00> : vector<64x128xf32>
    %15 = tpu.matmul %12, %14, %cst_14 {dimension_numbers = #tpu.dot_dimension_numbers<[1], [0], [0], [1], [0, 0, 1, 1], [], []>} : vector<64x48xf32>, vector<48x128xf32>, vector<64x128xf32> -> vector<64x128xf32>
    %16 = arith.addf %10, %15 : vector<64x128xf32>
    %c0_15 = arith.constant 0 : index
    %c0_16 = arith.constant 0 : index
    %17 = vector.load %arg3[%c0_15, %c0_16] : memref<1x128xf32, #tpu.memory_space<vmem>>, vector<1x128xf32>
    %18 = vector.broadcast %17 : vector<1x128xf32> to vector<64x128xf32>
    %19 = arith.addf %16, %18 : vector<64x128xf32>
    %cst_17 = arith.constant 0.000000e+00 : f32
    %20 = vector.broadcast %cst_17 : f32 to vector<64x128xf32>
    %21 = arith.maximumf %19, %20 : vector<64x128xf32>
    %c0_18 = arith.constant 0 : index
    %c0_19 = arith.constant 0 : index
    %c0_20 = arith.constant 0 : index
    %22 = vector.load %arg4[%c0_18, %c0_19, %c0_20] : memref<1x64x128xf32, #tpu.memory_space<vmem>>, vector<1x64x128xf32>
    %23 = vector.shape_cast %22 : vector<1x64x128xf32> to vector<64x128xf32>
    %24 = vector.shape_cast %21 : vector<64x128xf32> to vector<1x64x128xf32>
    tpu.vector_store %arg4[%c0_18, %c0_19, %c0_20], %24 {strides = array<i32>} : memref<1x64x128xf32, #tpu.memory_space<vmem>>, vector<1x64x128xf32>,
    return
  }
  func.func @transform_0(%arg0: i32) -> (i32, i32, i32) {
    %c0_i32 = arith.constant 0 : i32
    %c0_i32_0 = arith.constant 0 : i32
    %c0_i32_1 = arith.constant 0 : i32
    return %arg0, %c0_i32, %c0_i32_0 : i32, i32, i32
  }
  func.func @transform_1(%arg0: i32) -> (i32, i32, i32) {
    %c0_i32 = arith.constant 0 : i32
    %c0_i32_0 = arith.constant 0 : i32
    %c0_i32_1 = arith.constant 0 : i32
    %c0_i32_2 = arith.constant 0 : i32
    return %c0_i32, %c0_i32_0, %c0_i32_1 : i32, i32, i32
  }
  func.func @transform_2(%arg0: i32) -> (i32, i32) {
    %c0_i32 = arith.constant 0 : i32
    %c0_i32_0 = arith.constant 0 : i32
    %c0_i32_1 = arith.constant 0 : i32
    return %c0_i32, %c0_i32_0 : i32, i32
  }
  func.func @transform_3(%arg0: i32) -> (i32, i32, i32) {
    %c0_i32 = arith.constant 0 : i32
    %c0_i32_0 = arith.constant 0 : i32
    %c0_i32_1 = arith.constant 0 : i32
    return %arg0, %c0_i32, %c0_i32_0 : i32, i32, i32
  }
}

module attributes {stable_mosaic.version = 11 : i64} {
  func.func @_maxpool2x2_kernel(%arg0: i32, %arg1: memref<1x8x4x256xf32, #tpu.memory_space<vmem>>, %arg2: memref<1x4x4x128xf32, #tpu.memory_space<vmem>>) attributes {dimension_semantics = [#tpu.dimension_semantics<parallel>], iteration_bounds = array<i64: 2>, scalar_prefetch = 0 : i64, scratch_operands = 0 : i64, tpu.core_type = #tpu.core_type<tc>, window_params = [{transform_indices = @transform_0, window_bounds = array<i64: 1, 8, 4, 256>}, {transform_indices = @transform_1, window_bounds = array<i64: 1, 4, 4, 128>}]} {
    %c0 = arith.constant 0 : index
    %c0_0 = arith.constant 0 : index
    %c0_1 = arith.constant 0 : index
    %c0_2 = arith.constant 0 : index
    %0 = vector.load %arg1[%c0, %c0_0, %c0_1, %c0_2] : memref<1x8x4x256xf32, #tpu.memory_space<vmem>>, vector<1x8x4x256xf32>
    %1 = vector.shape_cast %0 : vector<1x8x4x256xf32> to vector<8x4x256xf32>
    %2 = vector.extract_strided_slice %1 {offsets = [0, 0, 0], sizes = [8, 4, 128], strides = [1, 1, 1]} : vector<8x4x256xf32> to vector<8x4x128xf32>
    %3 = vector.extract_strided_slice %1 {offsets = [0, 0, 128], sizes = [8, 4, 128], strides = [1, 1, 1]} : vector<8x4x256xf32> to vector<8x4x128xf32>
    %4 = arith.maximumf %2, %3 : vector<8x4x128xf32>
    %5 = vector.shape_cast %4 : vector<8x4x128xf32> to vector<4x2x4x128xf32>
    %6 = vector.extract_strided_slice %5 {offsets = [0, 0, 0, 0], sizes = [4, 1, 4, 128], strides = [1, 1, 1, 1]} : vector<4x2x4x128xf32> to vector<4x1x4x128xf32>
    %7 = vector.shape_cast %6 : vector<4x1x4x128xf32> to vector<4x4x128xf32>
    %8 = vector.extract_strided_slice %5 {offsets = [0, 1, 0, 0], sizes = [4, 1, 4, 128], strides = [1, 1, 1, 1]} : vector<4x2x4x128xf32> to vector<4x1x4x128xf32>
    %9 = vector.shape_cast %8 : vector<4x1x4x128xf32> to vector<4x4x128xf32>
    %10 = arith.maximumf %7, %9 : vector<4x4x128xf32>
    %c0_3 = arith.constant 0 : index
    %c0_4 = arith.constant 0 : index
    %c0_5 = arith.constant 0 : index
    %c0_6 = arith.constant 0 : index
    %11 = vector.load %arg2[%c0_3, %c0_4, %c0_5, %c0_6] : memref<1x4x4x128xf32, #tpu.memory_space<vmem>>, vector<1x4x4x128xf32>
    %12 = vector.shape_cast %11 : vector<1x4x4x128xf32> to vector<4x4x128xf32>
    %13 = vector.shape_cast %10 : vector<4x4x128xf32> to vector<1x4x4x128xf32>
    tpu.vector_store %arg2[%c0_3, %c0_4, %c0_5, %c0_6], %13 {strides = array<i32>} : memref<1x4x4x128xf32, #tpu.memory_space<vmem>>, vector<1x4x4x128xf32>,
    return
  }
  func.func @transform_0(%arg0: i32) -> (i32, i32, i32, i32) {
    %c0_i32 = arith.constant 0 : i32
    %c0_i32_0 = arith.constant 0 : i32
    %c0_i32_1 = arith.constant 0 : i32
    %c0_i32_2 = arith.constant 0 : i32
    return %arg0, %c0_i32, %c0_i32_0, %c0_i32_1 : i32, i32, i32, i32
  }
  func.func @transform_1(%arg0: i32) -> (i32, i32, i32, i32) {
    %c0_i32 = arith.constant 0 : i32
    %c0_i32_0 = arith.constant 0 : i32
    %c0_i32_1 = arith.constant 0 : i32
    %c0_i32_2 = arith.constant 0 : i32
    return %arg0, %c0_i32, %c0_i32_0, %c0_i32_1 : i32, i32, i32, i32
  }
}

module attributes {stable_mosaic.version = 11 : i64} {
  func.func @_mlp3_kernel(%arg0: memref<8x512xf32, #tpu.memory_space<vmem>>, %arg1: memref<512x128xf32, #tpu.memory_space<vmem>>, %arg2: memref<1x128xf32, #tpu.memory_space<vmem>>, %arg3: memref<128x128xf32, #tpu.memory_space<vmem>>, %arg4: memref<1x128xf32, #tpu.memory_space<vmem>>, %arg5: memref<128x128xf32, #tpu.memory_space<vmem>>, %arg6: memref<1x128xf32, #tpu.memory_space<vmem>>, %arg7: memref<8x128xf32, #tpu.memory_space<vmem>>) attributes {dimension_semantics = [], scalar_prefetch = 0 : i64, scratch_operands = 0 : i64, tpu.core_type = #tpu.core_type<tc>} {
    %c0 = arith.constant 0 : index
    %c0_0 = arith.constant 0 : index
    %0 = vector.load %arg0[%c0, %c0_0] : memref<8x512xf32, #tpu.memory_space<vmem>>, vector<8x512xf32>
    %c0_1 = arith.constant 0 : index
    %c0_2 = arith.constant 0 : index
    %1 = vector.load %arg1[%c0_1, %c0_2] : memref<512x128xf32, #tpu.memory_space<vmem>>, vector<512x128xf32>
    %cst = arith.constant dense<0.000000e+00> : vector<8x128xf32>
    %2 = tpu.matmul %0, %1, %cst {dimension_numbers = #tpu.dot_dimension_numbers<[1], [0], [0], [1], [0, 0, 1, 1], [], []>} : vector<8x512xf32>, vector<512x128xf32>, vector<8x128xf32> -> vector<8x128xf32>
    %c0_3 = arith.constant 0 : index
    %c0_4 = arith.constant 0 : index
    %3 = vector.load %arg2[%c0_3, %c0_4] : memref<1x128xf32, #tpu.memory_space<vmem>>, vector<1x128xf32>
    %4 = vector.broadcast %3 : vector<1x128xf32> to vector<8x128xf32>
    %5 = arith.addf %2, %4 : vector<8x128xf32>
    %cst_5 = arith.constant 0.000000e+00 : f32
    %6 = vector.broadcast %cst_5 : f32 to vector<8x128xf32>
    %7 = arith.maximumf %5, %6 : vector<8x128xf32>
    %c0_6 = arith.constant 0 : index
    %c0_7 = arith.constant 0 : index
    %8 = vector.load %arg3[%c0_6, %c0_7] : memref<128x128xf32, #tpu.memory_space<vmem>>, vector<128x128xf32>
    %cst_8 = arith.constant dense<0.000000e+00> : vector<8x128xf32>
    %9 = tpu.matmul %7, %8, %cst_8 {dimension_numbers = #tpu.dot_dimension_numbers<[1], [0], [0], [1], [0, 0, 1, 1], [], []>} : vector<8x128xf32>, vector<128x128xf32>, vector<8x128xf32> -> vector<8x128xf32>
    %c0_9 = arith.constant 0 : index
    %c0_10 = arith.constant 0 : index
    %10 = vector.load %arg4[%c0_9, %c0_10] : memref<1x128xf32, #tpu.memory_space<vmem>>, vector<1x128xf32>
    %11 = vector.broadcast %10 : vector<1x128xf32> to vector<8x128xf32>
    %12 = arith.addf %9, %11 : vector<8x128xf32>
    %cst_11 = arith.constant 0.000000e+00 : f32
    %13 = vector.broadcast %cst_11 : f32 to vector<8x128xf32>
    %14 = arith.maximumf %12, %13 : vector<8x128xf32>
    %c0_12 = arith.constant 0 : index
    %c0_13 = arith.constant 0 : index
    %15 = vector.load %arg5[%c0_12, %c0_13] : memref<128x128xf32, #tpu.memory_space<vmem>>, vector<128x128xf32>
    %cst_14 = arith.constant dense<0.000000e+00> : vector<8x128xf32>
    %16 = tpu.matmul %14, %15, %cst_14 {dimension_numbers = #tpu.dot_dimension_numbers<[1], [0], [0], [1], [0, 0, 1, 1], [], []>} : vector<8x128xf32>, vector<128x128xf32>, vector<8x128xf32> -> vector<8x128xf32>
    %c0_15 = arith.constant 0 : index
    %c0_16 = arith.constant 0 : index
    %17 = vector.load %arg6[%c0_15, %c0_16] : memref<1x128xf32, #tpu.memory_space<vmem>>, vector<1x128xf32>
    %18 = vector.broadcast %17 : vector<1x128xf32> to vector<8x128xf32>
    %19 = arith.addf %16, %18 : vector<8x128xf32>
    %c0_17 = arith.constant 0 : index
    %c0_18 = arith.constant 0 : index
    %20 = vector.load %arg7[%c0_17, %c0_18] : memref<8x128xf32, #tpu.memory_space<vmem>>, vector<8x128xf32>
    tpu.vector_store %arg7[%c0_17, %c0_18], %19 {strides = array<i32>} : memref<8x128xf32, #tpu.memory_space<vmem>>, vector<8x128xf32>,
    return
  }
}

</mosaic_0001>

<bundles_post_ra>
// kernel: _features_and_gate.6
= control target key start
LH: loop header
LB: loop body
LE: loop exit
PB: predicated region body
PF: predicated region fallthrough
CT: control target
= control target key end

     0   :  { %s275_s6 = smov 0   ;;  %s336_s0 = inlined_call_operand.vmem [shape: f32[2,16,8,256], index: 0, kind: input, shape index: {}]   ;;  %s337_s1 = inlined_call_operand.vmem [shape: f32[2,8,8,128], index: 1, kind: output, shape index: {}]  }
   0x1 LB: > { %s236_s7 = sadd.s32 4294967295, %s263_s6   ;;  %p240_p0 = scmp.ge.s32.totalorder %s263_s6, 1  ;;  %s263_s6 = sphi %s275_s6, %s11_s6  }
   0x2   : > { %p87_p1 = scmp.lt.s32.totalorder %s263_s6, 3 }
   0x4   : > { %p88_p2 = pnand %p240_p0, %p87_p1 }
   0x5   : > { %p107_p3 = scmp.lt.s32.totalorder (!%p88_p2), %s236_s7, 1 }
   0x6   : > { %91 = sbr.rel (%p88_p2) target bundleno = 30 (0x1e), region = 24 }
   0xb   : > { %s339_s7 = smov (!%p107_p3, %s236_s7), 1 }
   0xc   : > { %s247_s8 = sshll.u32 %s339_s7, 8  ;;  %s248_s12 = sshll.u32 %s339_s7, 6 }
   0xd   : > { %s286_s11 = scalar_lea.vmem %s336_s0, %s247_s8  ;;  %s300_s15 = scalar_lea.vmem %s337_s1, %s248_s12 }
   0xe   : > { %v117_v0 = vld [vmem:[%s286_s11] sm:$0xff]  ;;  %v118_v1 = vld [vmem:[%s286_s11 + $0x8] sm:$0xff]  ;;  %v119_v2 = vld [vmem:[%s286_s11 + $0x10] sm:$0xff] }
   0xf   : > { %v120_v3 = vld [vmem:[%s286_s11 + $0x18] sm:$0xff]  ;;  %v149_v4 = vmax.f32 %v117_v0, %v118_v1  ;;  %v121_v5 = vld [vmem:[%s286_s11 + $0x20] sm:$0xff]  ;;  %v122_v6 = vld [vmem:[%s286_s11 + $0x28] sm:$0xff] }
  0x10   : > { %v150_v7 = vmax.f32 %v119_v2, %v120_v3  ;;  %v123_v8 = vld [vmem:[%s286_s11 + $0x30] sm:$0xff]  ;;  %v124_v9 = vld [vmem:[%s286_s11 + $0x38] sm:$0xff]  ;;  %v151_v10 = vmax.f32 %v121_v5, %v122_v6  ;;  %v125_v11 = vld [vmem:[%s286_s11 + $0x40] sm:$0xff] }
  0x11   : > { %v152_v12 = vmax.f32 %v123_v8, %v124_v9  ;;  %v126_v13 = vld [vmem:[%s286_s11 + $0x48] sm:$0xff]  ;;  %v127_v14 = vld [vmem:[%s286_s11 + $0x50] sm:$0xff]  ;;  %v128_v15 = vld [vmem:[%s286_s11 + $0x58] sm:$0xff] }
  0x12   : > { %v165_v16 = vmax.f32 %v149_v4, %v150_v7  ;;  %v153_v17 = vmax.f32 %v125_v11, %v126_v13  ;;  %v154_v18 = vmax.f32 %v127_v14, %v128_v15  ;;  %v129_v19 = vld [vmem:[%s286_s11 + $0x60] sm:$0xff]  ;;  %v130_v20 = vld [vmem:[%s286_s11 + $0x68] sm:$0xff]  ;;  %v131_v21 = vld [vmem:[%s286_s11 + $0x70] sm:$0xff] }
  0x13   : > { %v166_v22 = vmax.f32 %v151_v10, %v152_v12  ;;  %v132_v23 = vld [vmem:[%s286_s11 + $0x78] sm:$0xff]  ;;  %v155_v24 = vmax.f32 %v129_v19, %v130_v20  ;;  %v133_v25 = vld [vmem:[%s286_s11 + $0x80] sm:$0xff]  ;;  %v134_v26 = vld [vmem:[%s286_s11 + $0x88] sm:$0xff] }
  0x14   : > { %173 = vst [vmem:[%s300_s15] sm:$0xff] %v165_v16  ;;  %v167_v27 = vmax.f32 %v153_v17, %v154_v18  ;;  %v156_v28 = vmax.f32 %v131_v21, %v132_v23  ;;  %v135_v29 = vld [vmem:[%s286_s11 + $0x90] sm:$0xff]  ;;  %v136_v30 = vld [vmem:[%s286_s11 + $0x98] sm:$0xff]  ;;  %v157_v31 = vmax.f32 %v133_v25, %v134_v26  ;;  %v137_v32 = vld [vmem:[%s286_s11 + $0xa0] sm:$0xff] }
  0x15   : > { %174 = vst [vmem:[%s300_s15 + $0x8] sm:$0xff] %v166_v22  ;;  %v158_v33 = vmax.f32 %v135_v29, %v136_v30  ;;  %v138_v34 = vld [vmem:[%s286_s11 + $0xa8] sm:$0xff]  ;;  %v139_v35 = vld [vmem:[%s286_s11 + $0xb0] sm:$0xff]  ;;  %v140_v36 = vld [vmem:[%s286_s11 + $0xb8] sm:$0xff] }
  0x16   : > { %175 = vst [vmem:[%s300_s15 + $0x10] sm:$0xff] %v167_v27  ;;  %v168_v37 = vmax.f32 %v155_v24, %v156_v28  ;;  %v159_v38 = vmax.f32 %v137_v32, %v138_v34  ;;  %v160_v39 = vmax.f32 %v139_v35, %v140_v36  ;;  %v141_v40 = vld [vmem:[%s286_s11 + $0xc0] sm:$0xff]  ;;  %v142_v41 = vld [vmem:[%s286_s11 + $0xc8] sm:$0xff]  ;;  %v143_v42 = vld [vmem:[%s286_s11 + $0xd0] sm:$0xff] }
  0x17   : > { %v169_v43 = vmax.f32 %v157_v31, %v158_v33  ;;  %v144_v44 = vld [vmem:[%s286_s11 + $0xd8] sm:$0xff]  ;;  %v161_v45 = vmax.f32 %v141_v40, %v142_v41  ;;  %v145_v46 = vld [vmem:[%s286_s11 + $0xe0] sm:$0xff]  ;;  %v146_v47 = vld [vmem:[%s286_s11 + $0xe8] sm:$0xff] }
  0x18   : > { %176 = vst [vmem:[%s300_s15 + $0x18] sm:$0xff] %v168_v37  ;;  %v170_v48 = vmax.f32 %v159_v38, %v160_v39  ;;  %v162_v49 = vmax.f32 %v143_v42, %v144_v44  ;;  %v147_v50 = vld [vmem:[%s286_s11 + $0xf0] sm:$0xff]  ;;  %v148_v51 = vld [vmem:[%s286_s11 + $0xf8] sm:$0xff]  ;;  %v163_v52 = vmax.f32 %v145_v46, %v146_v47 }
  0x19   : > { %177 = vst [vmem:[%s300_s15 + $0x20] sm:$0xff] %v169_v43  ;;  %v164_v53 = vmax.f32 %v147_v50, %v148_v51 }
  0x1a   : > { %178 = vst [vmem:[%s300_s15 + $0x28] sm:$0xff] %v170_v48  ;;  %v171_v54 = vmax.f32 %v161_v45, %v162_v49 }
  0x1b   : > { %v172_v55 = vmax.f32 %v163_v52, %v164_v53 }
  0x1c   : > { %179 = vst [vmem:[%s300_s15 + $0x30] sm:$0xff] %v171_v54 }
  0x1d   : > { %180 = vst [vmem:[%s300_s15 + $0x38] sm:$0xff] %v172_v55 }
  0x1e PF: > { %s11_s6 = sadd.s32 1, %s263_s6  }
  0x1f   : > { %p8_p4 = scmp.ge.s32.totalorder %s11_s6, 4  }
  0x21   :  { %10 = sbr.rel (!%p8_p4) target bundleno = 1 (0x1), region = 54 }

// kernel: _features_and_gate.5
= control target key start
LH: loop header
LB: loop body
LE: loop exit
PB: predicated region body
PF: predicated region fallthrough
CT: control target
= control target key end

     0   :  { %s1733_s12 = smov 0   ;;  %s2161_s0 = inlined_call_operand.vmem [shape: f32[2,288,9], index: 0, kind: input, shape index: {}]   ;;  %s2162_s1 = inlined_call_operand.vmem [shape: f32[3,9,128], index: 1, kind: input, shape index: {}]   ;;  %s2163_s2 = inlined_call_operand.vmem [shape: f32[1,128], index: 2, kind: input, shape index: {}]   ;;  %s2164_s3 = inlined_call_operand.vmem [shape: f32[2,256,128], index: 3, kind: output, shape index: {}]  }
   0x1 LB: > { %s1319_s13 = sadd.s32 4294967295, %s1711_s12   ;;  %p1323_p0 = scmp.ge.s32.totalorder %s1711_s12, 1  ;;  %s1711_s12 = sphi %s1733_s12, %s13_s12  }
   0x2   : > { %p137_p1 = scmp.lt.s32.totalorder %s1711_s12, 3 }
   0x4   : > { %p138_p2 = pnand %p1323_p0, %p137_p1 }
   0x5   : > { %p161_p3 = scmp.lt.s32.totalorder (!%p138_p2), %s1319_s13, 1 }
   0x6   : > { %141 = sbr.rel (%p138_p2) target bundleno = 314 (0x13a), region = 32 }
   0xb   : > { %v1328_v0 = vld [vmem:[%s2162_s1 + $0x18] sm:$0x1]  ;;  %vm307_vm0 = vcmask 1040384   ;;  %v1327_v1 = vld [vmem:[%s2162_s1 + $0x10] sm:$0xff]  ;;  %s2166_s13 = smov (!%p161_p3, %s1319_s13), 1  ;;  %vm210_vm1 = vcmask 72704  }
   0xc   : > { %1692 = vmatprep.subr.msk.mxu1 %vm307_vm0, %v1328_v0  ;;  %1536 = vmatprep.subr.msk.mxu0 %vm307_vm0, %v1328_v0  ;;  %v204_v2 = vld [vmem:[%s2162_s1 + $0x8] sm:$0x1]  ;;  %s1696_s22 = smul.u32 288, %s2166_s13  ;;  %v203_v10 = vld [vmem:[%s2162_s1] sm:$0xff]  ;;  %s1433_s5 = sshll.u32 %s2166_s13, 8 }
   0xd   : > { %1694 = vmatpush3.msk.msra.mxu1 %vm307_vm0, %v1328_v0  ;;  %1537 = vmatpush3.msk.msra.mxu0 %vm307_vm0, %v1328_v0  ;;  %v1396_v3 = vld [vmem:[%s2162_s1 + $0x28] sm:$0x1]  ;;  %v1395_v11 = vld [vmem:[%s2162_s1 + $0x20] sm:$0xff]  ;;  %s2068_s8 = scalar_lea.vmem %s2164_s3, %s1433_s5 }
   0xe   : > { %1693 = vmatprep.subr.mxu1 %v1327_v1  ;;  %1538 = vmatprep.subr.mxu0 %v1327_v1  ;;  %s1765_s25 = scalar_lea.vmem %s2161_s0, %s1696_s22 }
   0xf   : > { %1695 = vmatpush3.msra.mxu1 %v1327_v1  ;;  %1539 = vmatpush3.msra.mxu0 %v1327_v1  ;;  %v1768_v4 = vld [vmem:[%s1765_s25 + $0x10] sm:$0xff]  ;;  %v1774_v6 = vld [vmem:[%s1765_s25 + $0x18] sm:$0xff]  ;;  %v1784_v8 = vld [vmem:[%s1765_s25 + $0x20] sm:$0xff] }
  0x10   : > { %1588 = vmatprep.subr.msk.mxu1 %vm307_vm0, %v204_v2  ;;  %1640 = vmatprep.subr.msk.mxu0 %vm307_vm0, %v1396_v3  ;;  %v1771_v5 = vld [vmem:[%s1765_s25 + $0x90] sm:$0xff]  ;;  %v1781_v7 = vld [vmem:[%s1765_s25 + $0x98] sm:$0xff]  ;;  %v1787_v9 = vld [vmem:[%s1765_s25 + $0xa0] sm:$0xff] }
  0x11   : > { %1540 = vmatprep.mubr.msk.f32.mxu0 %vm210_vm1, %v1768_v4  ;;  %1564 = vmatprep.mubr.msk.f32.mxu1 %vm210_vm1, %v1771_v5  ;;  %v1802_v12 = vld [vmem:[%s1765_s25 + $0x28] sm:$0xff]  ;;  %v1812_v14 = vld [vmem:[%s1765_s25 + $0x30] sm:$0xff]  ;;  %v178_v16 = vld [vmem:[%s1765_s25 + $0x38] sm:$0xff] }
  0x12   : > { %1541 = vmatmul.mubr.msk.f32.vlgmr.msra.gmra.mxu0 %vm210_vm1, %v1774_v6  ;;  %1565 = vmatmul.mubr.msk.f32.vlgmr.msra.gmra.mxu1 %vm210_vm1, %v1781_v7  ;;  %v1805_v13 = vld [vmem:[%s1765_s25 + $0xa8] sm:$0xff]  ;;  %v1815_v15 = vld [vmem:[%s1765_s25 + $0xb0] sm:$0xff]  ;;  %v1827_v17 = vld [vmem:[%s1765_s25 + $0xb8] sm:$0xff] }
  0x13   : > { %1589 = vmatpush3.msk.msra.mxu1 %vm307_vm0, %v204_v2  ;;  %1641 = vmatpush3.msk.msra.mxu0 %vm307_vm0, %v1396_v3  ;;  %v179_v18 = vld [vmem:[%s1765_s25 + $0x40] sm:$0xff]  ;;  %v180_v20 = vld [vmem:[%s1765_s25 + $0x48] sm:$0xff]  ;;  %v181_v22 = vld [vmem:[%s1765_s25 + $0x50] sm:$0xff] }
  0x14   : > { %1543 = vmatprep.mubr.msk.f32.mxu0 %vm210_vm1, %v1784_v8  ;;  %1567 = vmatprep.mubr.msk.f32.mxu1 %vm210_vm1, %v1787_v9  ;;  %v1831_v19 = vld [vmem:[%s1765_s25 + $0xc0] sm:$0xff]  ;;  %v1841_v21 = vld [vmem:[%s1765_s25 + $0xc8] sm:$0xff]  ;;  %v1845_v23 = vld [vmem:[%s1765_s25 + $0xd0] sm:$0xff] }
  0x15   : > { %1590 = vmatprep.subr.mxu1 %v203_v10  ;;  %1642 = vmatprep.subr.mxu0 %v1395_v11  ;;  %v182_v24 = vld [vmem:[%s1765_s25 + $0x58] sm:$0xff]  ;;  %v183_v26 = vld [vmem:[%s1765_s25 + $0x60] sm:$0xff]  ;;  %v184_v28 = vld [vmem:[%s1765_s25 + $0x68] sm:$0xff] }
  0x16   : > { %1544 = vmatmul.mubr.msk.f32.gmra.mxu0 %vm210_vm1, %v1802_v12  ;;  %1568 = vmatmul.mubr.msk.f32.gmra.mxu1 %vm210_vm1, %v1805_v13  ;;  %v1855_v25 = vld [vmem:[%s1765_s25 + $0xd8] sm:$0xff]  ;;  %v1859_v27 = vld [vmem:[%s1765_s25 + $0xe0] sm:$0xff]  ;;  %v1869_v29 = vld [vmem:[%s1765_s25 + $0xe8] sm:$0xff] }
  0x17   : > { %1546 = vmatprep.mubr.msk.f32.mxu0 %vm210_vm1, %v1812_v14  ;;  %1570 = vmatprep.mubr.msk.f32.mxu1 %vm210_vm1, %v1815_v15  ;;  %v185_v30 = vld [vmem:[%s1765_s25 + $0x70] sm:$0xff]  ;;  %v186_v32 = vld [vmem:[%s1765_s25 + $0x78] sm:$0xff]  ;;  %v187_v34 = vld [vmem:[%s1765_s25 + $0x80] sm:$0xff] }
  0x18   : > { %1591 = vmatpush3.msra.mxu1 %v203_v10  ;;  %1643 = vmatpush3.msra.mxu0 %v1395_v11  ;;  %v1873_v31 = vld [vmem:[%s1765_s25 + $0xf0] sm:$0xff]  ;;  %v1883_v33 = vld [vmem:[%s1765_s25 + $0xf8] sm:$0xff]  ;;  %v1887_v35 = vld [vmem:[%s1765_s25 + $0x100] sm:$0xff] }
  0x19   : > { %v188_v36 = vld [vmem:[%s1765_s25 + $0x88] sm:$0xff]  ;;  %v171_v38 = vld [vmem:[%s1765_s25] sm:$0xff]  ;;  %v800_v40 = vld [vmem:[%s1765_s25 + $0x110] sm:$0xff] }
  0x1a   : > { %1547 = vmatmul.mubr.msk.f32.gmra.mxu0 %vm210_vm1, %v178_v16  ;;  %1571 = vmatmul.mubr.msk.f32.gmra.mxu1 %vm210_vm1, %v1827_v17  ;;  %v1897_v37 = vld [vmem:[%s1765_s25 + $0x108] sm:$0xff]  ;;  %v801_v41 = vld [vmem:[%s1765_s25 + $0x118] sm:$0xff] }
  0x1b   : > { %1549 = vmatprep.mubr.msk.f32.mxu0 %vm210_vm1, %v179_v18  ;;  %1573 = vmatprep.mubr.msk.f32.mxu1 %vm210_vm1, %v1831_v19  ;;  %v172_v39 = vld [vmem:[%s1765_s25 + $0x8] sm:$0xff] }
  0x1e   : > { %1550 = vmatmul.mubr.msk.f32.gmra.mxu0 %vm210_vm1, %v180_v20  ;;  %1574 = vmatmul.mubr.msk.f32.gmra.mxu1 %vm210_vm1, %v1841_v21 }
  0x1f   : > { %1552 = vmatprep.mubr.msk.f32.mxu0 %vm210_vm1, %v181_v22  ;;  %1576 = vmatprep.mubr.msk.f32.mxu1 %vm210_vm1, %v1845_v23 }
  0x22   : > { %1553 = vmatmul.mubr.msk.f32.gmra.mxu0 %vm210_vm1, %v182_v24  ;;  %1577 = vmatmul.mubr.msk.f32.gmra.mxu1 %vm210_vm1, %v1855_v25 }
  0x23   : > { %1555 = vmatprep.mubr.msk.f32.mxu0 %vm210_vm1, %v183_v26  ;;  %1579 = vmatprep.mubr.msk.f32.mxu1 %vm210_vm1, %v1859_v27 }
  0x26   : > { %1556 = vmatmul.mubr.msk.f32.gmra.mxu0 %vm210_vm1, %v184_v28  ;;  %1580 = vmatmul.mubr.msk.f32.gmra.mxu1 %vm210_vm1, %v1869_v29 }
  0x27   : > { %1558 = vmatprep.mubr.msk.f32.mxu0 %vm210_vm1, %v185_v30  ;;  %1582 = vmatprep.mubr.msk.f32.mxu1 %vm210_vm1, %v1873_v31 }
  0x2a   : > { %1559 = vmatmul.mubr.msk.f32.gmra.mxu0 %vm210_vm1, %v186_v32  ;;  %1583 = vmatmul.mubr.msk.f32.gmra.mxu1 %vm210_vm1, %v1883_v33 }
  0x2b   : > { %1561 = vmatprep.mubr.msk.f32.mxu0 %vm210_vm1, %v187_v34  ;;  %1585 = vmatprep.mubr.msk.f32.mxu1 %vm210_vm1, %v1887_v35 }
  0x2e   : > { %1562 = vmatmul.mubr.msk.f32.gmra.mxu0 %vm210_vm1, %v188_v36  ;;  %1586 = vmatmul.mubr.msk.f32.gmra.mxu1 %vm210_vm1, %v1897_v37 }
  0x2f   : > { %1592 = vmatprep.mubr.msk.f32.mxu1 %vm210_vm1, %v171_v38  ;;  %1644 = vmatprep.mubr.msk.f32.mxu0 %vm210_vm1, %v1784_v8 }
  0x32   : > { %1593 = vmatmul.mubr.msk.f32.vlgmr.msra.gmra.mxu1 %vm210_vm1, %v172_v39  ;;  %1645 = vmatmul.mubr.msk.f32.vlgmr.msra.gmra.mxu0 %vm210_vm1, %v1802_v12 }
  0x33   : > { %1595 = vmatprep.mubr.msk.f32.mxu1 %vm210_vm1, %v1768_v4  ;;  %1647 = vmatprep.mubr.msk.f32.mxu0 %vm210_vm1, %v1812_v14 }
  0x36   : > { %1596 = vmatmul.mubr.msk.f32.gmra.mxu1 %vm210_vm1, %v1774_v6  ;;  %1648 = vmatmul.mubr.msk.f32.gmra.mxu0 %vm210_vm1, %v178_v16 }
  0x37   : > { %1598 = vmatprep.mubr.msk.f32.mxu1 %vm210_vm1, %v1784_v8  ;;  %1650 = vmatprep.mubr.msk.f32.mxu0 %vm210_vm1, %v179_v18 }
  0x3a   : > { %1599 = vmatmul.mubr.msk.f32.gmra.mxu1 %vm210_vm1, %v1802_v12  ;;  %1651 = vmatmul.mubr.msk.f32.gmra.mxu0 %vm210_vm1, %v180_v20 }
  0x3b   : > { %1601 = vmatprep.mubr.msk.f32.mxu1 %vm210_vm1, %v1812_v14  ;;  %1653 = vmatprep.mubr.msk.f32.mxu0 %vm210_vm1, %v181_v22 }
  0x3e   : > { %1602 = vmatmul.mubr.msk.f32.gmra.mxu1 %vm210_vm1, %v178_v16  ;;  %1654 = vmatmul.mubr.msk.f32.gmra.mxu0 %vm210_vm1, %v182_v24 }
  0x3f   : > { %1604 = vmatprep.mubr.msk.f32.mxu1 %vm210_vm1, %v179_v18  ;;  %1656 = vmatprep.mubr.msk.f32.mxu0 %vm210_vm1, %v183_v26 }
  0x42   : > { %1605 = vmatmul.mubr.msk.f32.gmra.mxu1 %vm210_vm1, %v180_v20  ;;  %1657 = vmatmul.mubr.msk.f32.gmra.mxu0 %vm210_vm1, %v184_v28 }
  0x43   : > { %1607 = vmatprep.mubr.msk.f32.mxu1 %vm210_vm1, %v181_v22  ;;  %1659 = vmatprep.mubr.msk.f32.mxu0 %vm210_vm1, %v185_v30 }
  0x46   : > { %1608 = vmatmul.mubr.msk.f32.gmra.mxu1 %vm210_vm1, %v182_v24  ;;  %1660 = vmatmul.mubr.msk.f32.gmra.mxu0 %vm210_vm1, %v186_v32 }
  0x47   : > { %1610 = vmatprep.mubr.msk.f32.mxu1 %vm210_vm1, %v183_v26  ;;  %1662 = vmatprep.mubr.msk.f32.mxu0 %vm210_vm1, %v187_v34 }
  0x4a   : > { %1611 = vmatmul.mubr.msk.f32.gmra.mxu1 %vm210_vm1, %v184_v28  ;;  %1663 = vmatmul.mubr.msk.f32.gmra.mxu0 %vm210_vm1, %v188_v36 }
  0x4b   : > { %1613 = vmatprep.mubr.msk.f32.mxu1 %vm210_vm1, %v185_v30  ;;  %1665 = vmatprep.mubr.msk.f32.mxu0 %vm210_vm1, %v1771_v5 }
  0x4e   : > { %1614 = vmatmul.mubr.msk.f32.gmra.mxu1 %vm210_vm1, %v186_v32  ;;  %1666 = vmatmul.mubr.msk.f32.gmra.mxu0 %vm210_vm1, %v1781_v7 }
  0x4f   : > { %1616 = vmatprep.mubr.msk.f32.mxu1 %vm210_vm1, %v187_v34  ;;  %1668 = vmatprep.mubr.msk.f32.mxu0 %vm210_vm1, %v1787_v9 }
  0x52   : > { %1617 = vmatmul.mubr.msk.f32.gmra.mxu1 %vm210_vm1, %v188_v36  ;;  %1669 = vmatmul.mubr.msk.f32.gmra.mxu0 %vm210_vm1, %v1805_v13 }
  0x53   : > { %1619 = vmatprep.mubr.msk.f32.mxu1 %vm210_vm1, %v1771_v5  ;;  %1671 = vmatprep.mubr.msk.f32.mxu0 %vm210_vm1, %v1815_v15 }
  0x56   : > { %1620 = vmatmul.mubr.msk.f32.gmra.mxu1 %vm210_vm1, %v1781_v7  ;;  %1672 = vmatmul.mubr.msk.f32.gmra.mxu0 %vm210_vm1, %v1827_v17 }
  0x57   : > { %1622 = vmatprep.mubr.msk.f32.mxu1 %vm210_vm1, %v1787_v9  ;;  %1674 = vmatprep.mubr.msk.f32.mxu0 %vm210_vm1, %v1831_v19 }
  0x5a   : > { %1623 = vmatmul.mubr.msk.f32.gmra.mxu1 %vm210_vm1, %v1805_v13  ;;  %1675 = vmatmul.mubr.msk.f32.gmra.mxu0 %vm210_vm1, %v1841_v21  ;;  %v2061_v13 = vld [vmem:[%s2163_s2] ss:$0 sm:$0xff] }
  0x5b   : > { %1625 = vmatprep.mubr.msk.f32.mxu1 %vm210_vm1, %v1815_v15  ;;  %1677 = vmatprep.mubr.msk.f32.mxu0 %vm210_vm1, %v1845_v23 }
  0x5e   : > { %1626 = vmatmul.mubr.msk.f32.gmra.mxu1 %vm210_vm1, %v1827_v17  ;;  %1678 = vmatmul.mubr.msk.f32.gmra.mxu0 %vm210_vm1, %v1855_v25 }
  0x5f   : > { %1628 = vmatprep.mubr.msk.f32.mxu1 %vm210_vm1, %v1831_v19  ;;  %1680 = vmatprep.mubr.msk.f32.mxu0 %vm210_vm1, %v1859_v27 }
  0x62   : > { %1629 = vmatmul.mubr.msk.f32.gmra.mxu1 %vm210_vm1, %v1841_v21  ;;  %1681 = vmatmul.mubr.msk.f32.gmra.mxu0 %vm210_vm1, %v1869_v29 }
  0x63   : > { %1631 = vmatprep.mubr.msk.f32.mxu1 %vm210_vm1, %v1845_v23  ;;  %1683 = vmatprep.mubr.msk.f32.mxu0 %vm210_vm1, %v1873_v31 }
  0x66   : > { %1632 = vmatmul.mubr.msk.f32.gmra.mxu1 %vm210_vm1, %v1855_v25  ;;  %1684 = vmatmul.mubr.msk.f32.gmra.mxu0 %vm210_vm1, %v1883_v33 }
  0x67   : > { %1634 = vmatprep.mubr.msk.f32.mxu1 %vm210_vm1, %v1859_v27  ;;  %1686 = vmatprep.mubr.msk.f32.mxu0 %vm210_vm1, %v1887_v35 }
  0x6a   : > { %1635 = vmatmul.mubr.msk.f32.gmra.mxu1 %vm210_vm1, %v1869_v29  ;;  %1687 = vmatmul.mubr.msk.f32.gmra.mxu0 %vm210_vm1, %v1897_v37 }
  0x6b   : > { %1637 = vmatprep.mubr.msk.f32.mxu1 %vm210_vm1, %v1873_v31  ;;  %1689 = vmatprep.mubr.msk.f32.mxu0 %vm210_vm1, %v800_v40 }
  0x6e   : > { %1638 = vmatmul.mubr.msk.f32.gmra.mxu1 %vm210_vm1, %v1883_v33  ;;  %1690 = vmatmul.mubr.msk.f32.gmra.mxu0 %vm210_vm1, %v801_v41 }
  0xd2   : > { %v1542_v42 = vpop.f32.mrf.mxu0  ;;  %v2008_v43 = vpop.f32.mrf.mxu1 }
  0xd4   : > { %v377_v44 = vpop.f32.mrf.mxu0  ;;  %v2010_v45 = vpop.f32.mrf.mxu1 }
  0xd6   : > { %v1545_v46 = vpop.f32.mrf.mxu0  ;;  %v2012_v47 = vpop.f32.mrf.mxu1 }
  0xd8   : > { %v387_v48 = vpop.f32.mrf.mxu0  ;;  %v2014_v49 = vpop.f32.mrf.mxu1 }
  0xda   : > { %v1548_v50 = vpop.f32.mrf.mxu0  ;;  %v2016_v51 = vpop.f32.mrf.mxu1 }
  0xdc   : > { %v397_v52 = vpop.f32.mrf.mxu0  ;;  %v2018_v53 = vpop.f32.mrf.mxu1 }
  0xde   : > { %v1551_v54 = vpop.f32.mrf.mxu0  ;;  %v2020_v55 = vpop.f32.mrf.mxu1 }
  0xe0   : > { %v2022_v56 = vpop.f32.mrf.mxu0  ;;  %v2024_v57 = vpop.f32.mrf.mxu1 }
  0xe2   : > { %v2026_v58 = vpop.f32.mrf.mxu0  ;;  %v2028_v59 = vpop.f32.mrf.mxu1 }
  0xe4   : > { %v2030_v60 = vpop.f32.mrf.mxu0  ;;  %v2032_v61 = vpop.f32.mrf.mxu1 }
  0xe6   : > { %v2034_v62 = vpop.f32.mrf.mxu0  ;;  %v2036_v63 = vpop.f32.mrf.mxu1 }
  0xe8   : > { %v2038_v0 = vpop.f32.mrf.mxu0  ;;  %v2040_v1 = vpop.f32.mrf.mxu1 }
  0xea   : > { %v2042_v2 = vpop.f32.mrf.mxu0  ;;  %v2044_v3 = vpop.f32.mrf.mxu1 }
  0xec   : > { %v2046_v4 = vpop.f32.mrf.mxu0  ;;  %v2048_v5 = vpop.f32.mrf.mxu1 }
  0xee   : > { %v2050_v6 = vpop.f32.mrf.mxu0  ;;  %v2052_v7 = vpop.f32.mrf.mxu1 }
  0xf0   : > { %v2054_v8 = vpop.f32.mrf.mxu0  ;;  %v2056_v9 = vpop.f32.mrf.mxu1 }
  0xf2   : > { %v1594_v10 = vpop.f32.mrf.mxu1  ;;  %v1646_v11 = vpop.f32.mrf.mxu0 }
  0xf3   : > { %v617_v12 = vadd.f32 %v1594_v10, %v1542_v42 }
  0xf4   : > { %v611_v14 = vpop.f32.mrf.mxu1  ;;  %v970_v15 = vpop.f32.mrf.mxu0 }
  0xf5   : > { %v1130_v16 = vadd.f32 %v1646_v11, %v617_v12  ;;  %v612_v17 = vadd.f32 %v611_v14, %v377_v44 }
  0xf6   : > { %v1597_v18 = vpop.f32.mrf.mxu1  ;;  %v1649_v19 = vpop.f32.mrf.mxu0 }
  0xf7   : > { %v1169_v20 = vadd.f32 %v2061_v13, %v1130_v16  ;;  %v1129_v21 = vadd.f32 %v970_v15, %v612_v17  ;;  %v627_v22 = vadd.f32 %v1597_v18, %v1545_v46 }
  0xf8   : > { %v621_v23 = vpop.f32.mrf.mxu1  ;;  %v980_v24 = vpop.f32.mrf.mxu0 }
  0xf9   : > { %v1201_v25 = vmax.f32 %v1169_v20, 0.0  ;;  %v1168_v26 = vadd.f32 %v2061_v13, %v1129_v21  ;;  %v1132_v27 = vadd.f32 %v1649_v19, %v627_v22  ;;  %v622_v28 = vadd.f32 %v621_v23, %v387_v48 }
  0xfa   : > { %v1600_v29 = vpop.f32.mrf.mxu1  ;;  %v1652_v30 = vpop.f32.mrf.mxu0 }
  0xfb   : > { %1233 = vst [vmem:[%s2068_s8 + $0x8] sm:$0xff] %v1201_v25  ;;  %v1200_v31 = vmax.f32 %v1168_v26, 0.0  ;;  %v1171_v32 = vadd.f32 %v2061_v13, %v1132_v27  ;;  %v1131_v33 = vadd.f32 %v980_v24, %v622_v28  ;;  %v637_v34 = vadd.f32 %v1600_v29, %v1548_v50 }
  0xfc   : > { %v631_v35 = vpop.f32.mrf.mxu1  ;;  %v990_v36 = vpop.f32.mrf.mxu0 }
  0xfd   : > { %1232 = vst [vmem:[%s2068_s8] sm:$0xff] %v1200_v31  ;;  %v1203_v37 = vmax.f32 %v1171_v32, 0.0  ;;  %v1170_v38 = vadd.f32 %v2061_v13, %v1131_v33  ;;  %v1134_v39 = vadd.f32 %v1652_v30, %v637_v34  ;;  %v632_v40 = vadd.f32 %v631_v35, %v397_v52 }
  0xfe   : > { %v1603_v41 = vpop.f32.mrf.mxu1  ;;  %v1655_v42 = vpop.f32.mrf.mxu0 }
  0xff   : > { %1235 = vst [vmem:[%s2068_s8 + $0x18] sm:$0xff] %v1203_v37  ;;  %v1202_v44 = vmax.f32 %v1170_v38, 0.0  ;;  %v1173_v46 = vadd.f32 %v2061_v13, %v1134_v39  ;;  %v1133_v48 = vadd.f32 %v990_v36, %v632_v40  ;;  %v647_v10 = vadd.f32 %v1603_v41, %v1551_v54 }
 0x100   : > { %v641_v11 = vpop.f32.mrf.mxu1  ;;  %v1000_v50 = vpop.f32.mrf.mxu0 }
 0x101   : > { %1234 = vst [vmem:[%s2068_s8 + $0x10] sm:$0xff] %v1202_v44  ;;  %v1205_v12 = vmax.f32 %v1173_v46, 0.0  ;;  %v1172_v14 = vadd.f32 %v2061_v13, %v1133_v48  ;;  %v1136_v15 = vadd.f32 %v1655_v42, %v647_v10  ;;  %v642_v16 = vadd.f32 %v641_v11, %v2022_v56 }
 0x102   : > { %v1606_v52 = vpop.f32.mrf.mxu1  ;;  %v1658_v17 = vpop.f32.mrf.mxu0 }
 0x103   : > { %1237 = vst [vmem:[%s2068_s8 + $0x28] sm:$0xff] %v1205_v12  ;;  %v1204_v18 = vmax.f32 %v1172_v14, 0.0  ;;  %v1175_v19 = vadd.f32 %v2061_v13, %v1136_v15  ;;  %v1135_v20 = vadd.f32 %v1000_v50, %v642_v16  ;;  %v657_v54 = vadd.f32 %v1606_v52, %v2026_v58 }
 0x104   : > { %v651_v21 = vpop.f32.mrf.mxu1  ;;  %v1010_v22 = vpop.f32.mrf.mxu0 }
 0x105   : > { %1236 = vst [vmem:[%s2068_s8 + $0x20] sm:$0xff] %v1204_v18  ;;  %v1207_v23 = vmax.f32 %v1175_v19, 0.0  ;;  %v1174_v24 = vadd.f32 %v2061_v13, %v1135_v20  ;;  %v1138_v25 = vadd.f32 %v1658_v17, %v657_v54  ;;  %v652_v56 = vadd.f32 %v651_v21, %v2030_v60 }
 0x106   : > { %v1609_v26 = vpop.f32.mrf.mxu1  ;;  %v1661_v27 = vpop.f32.mrf.mxu0 }
 0x107   : > { %1239 = vst [vmem:[%s2068_s8 + $0x38] sm:$0xff] %v1207_v23  ;;  %v1206_v28 = vmax.f32 %v1174_v24, 0.0  ;;  %v1177_v29 = vadd.f32 %v2061_v13, %v1138_v25  ;;  %v1137_v30 = vadd.f32 %v1010_v22, %v652_v56  ;;  %v667_v58 = vadd.f32 %v1609_v26, %v2034_v62 }
 0x108   : > { %v661_v31 = vpop.f32.mrf.mxu1  ;;  %v1020_v32 = vpop.f32.mrf.mxu0 }
 0x109   : > { %1238 = vst [vmem:[%s2068_s8 + $0x30] sm:$0xff] %v1206_v28  ;;  %v1209_v33 = vmax.f32 %v1177_v29, 0.0  ;;  %v1176_v34 = vadd.f32 %v2061_v13, %v1137_v30  ;;  %v1140_v35 = vadd.f32 %v1661_v27, %v667_v58  ;;  %v662_v60 = vadd.f32 %v661_v31, %v2038_v0 }
 0x10a   : > { %v1612_v36 = vpop.f32.mrf.mxu1  ;;  %v1664_v37 = vpop.f32.mrf.mxu0 }
 0x10b   : > { %1241 = vst [vmem:[%s2068_s8 + $0x48] sm:$0xff] %v1209_v33  ;;  %v1208_v38 = vmax.f32 %v1176_v34, 0.0  ;;  %v1179_v39 = vadd.f32 %v2061_v13, %v1140_v35  ;;  %v1139_v40 = vadd.f32 %v1020_v32, %v662_v60  ;;  %v677_v62 = vadd.f32 %v1612_v36, %v2042_v2 }
 0x10c   : > { %v671_v41 = vpop.f32.mrf.mxu1  ;;  %v1030_v42 = vpop.f32.mrf.mxu0 }
 0x10d   : > { %1240 = vst [vmem:[%s2068_s8 + $0x40] sm:$0xff] %v1208_v38  ;;  %v1211_v44 = vmax.f32 %v1179_v39, 0.0  ;;  %v1178_v46 = vadd.f32 %v2061_v13, %v1139_v40  ;;  %v1142_v48 = vadd.f32 %v1664_v37, %v677_v62  ;;  %v672_v0 = vadd.f32 %v671_v41, %v2046_v4 }
 0x10e   : > { %v1615_v10 = vpop.f32.mrf.mxu1  ;;  %v1667_v11 = vpop.f32.mrf.mxu0 }
 0x10f   : > { %1243 = vst [vmem:[%s2068_s8 + $0x58] sm:$0xff] %v1211_v44  ;;  %v1210_v50 = vmax.f32 %v1178_v46, 0.0  ;;  %v1181_v12 = vadd.f32 %v2061_v13, %v1142_v48  ;;  %v1141_v14 = vadd.f32 %v1030_v42, %v672_v0  ;;  %v687_v2 = vadd.f32 %v1615_v10, %v2050_v6 }
 0x110   : > { %v681_v15 = vpop.f32.mrf.mxu1  ;;  %v1040_v16 = vpop.f32.mrf.mxu0 }
 0x111   : > { %1242 = vst [vmem:[%s2068_s8 + $0x50] sm:$0xff] %v1210_v50  ;;  %v1213_v52 = vmax.f32 %v1181_v12, 0.0  ;;  %v1180_v17 = vadd.f32 %v2061_v13, %v1141_v14  ;;  %v1144_v18 = vadd.f32 %v1667_v11, %v687_v2  ;;  %v682_v4 = vadd.f32 %v681_v15, %v2054_v8 }
 0x112   : > { %v1618_v19 = vpop.f32.mrf.mxu1  ;;  %v1670_v20 = vpop.f32.mrf.mxu0 }
 0x113   : > { %1245 = vst [vmem:[%s2068_s8 + $0x68] sm:$0xff] %v1213_v52  ;;  %v1212_v54 = vmax.f32 %v1180_v17, 0.0  ;;  %v1183_v21 = vadd.f32 %v2061_v13, %v1144_v18  ;;  %v1143_v22 = vadd.f32 %v1040_v16, %v682_v4  ;;  %v697_v6 = vadd.f32 %v1618_v19, %v2008_v43 }
 0x114   : > { %v691_v23 = vpop.f32.mrf.mxu1  ;;  %v1050_v24 = vpop.f32.mrf.mxu0 }
 0x115   : > { %1244 = vst [vmem:[%s2068_s8 + $0x60] sm:$0xff] %v1212_v54  ;;  %v1215_v25 = vmax.f32 %v1183_v21, 0.0  ;;  %v1182_v56 = vadd.f32 %v2061_v13, %v1143_v22  ;;  %v1146_v26 = vadd.f32 %v1670_v20, %v697_v6  ;;  %v692_v8 = vadd.f32 %v691_v23, %v2010_v45 }
 0x116   : > { %v1621_v27 = vpop.f32.mrf.mxu1  ;;  %v1673_v28 = vpop.f32.mrf.mxu0 }
 0x117   : > { %1247 = vst [vmem:[%s2068_s8 + $0x78] sm:$0xff] %v1215_v25  ;;  %v1214_v29 = vmax.f32 %v1182_v56, 0.0  ;;  %v1185_v30 = vadd.f32 %v2061_v13, %v1146_v26  ;;  %v1145_v58 = vadd.f32 %v1050_v24, %v692_v8  ;;  %v707_v43 = vadd.f32 %v1621_v27, %v2012_v47 }
 0x118   : > { %v701_v31 = vpop.f32.mrf.mxu1  ;;  %v1060_v32 = vpop.f32.mrf.mxu0 }
 0x119   : > { %1246 = vst [vmem:[%s2068_s8 + $0x70] sm:$0xff] %v1214_v29  ;;  %v1217_v33 = vmax.f32 %v1185_v30, 0.0  ;;  %v1184_v34 = vadd.f32 %v2061_v13, %v1145_v58  ;;  %v1148_v35 = vadd.f32 %v1673_v28, %v707_v43  ;;  %v702_v45 = vadd.f32 %v701_v31, %v2014_v49 }
 0x11a   : > { %v1624_v60 = vpop.f32.mrf.mxu1  ;;  %v1676_v36 = vpop.f32.mrf.mxu0 }
 0x11b   : > { %1249 = vst [vmem:[%s2068_s8 + $0x88] sm:$0xff] %v1217_v33  ;;  %v1216_v37 = vmax.f32 %v1184_v34, 0.0  ;;  %v1187_v38 = vadd.f32 %v2061_v13, %v1148_v35  ;;  %v1147_v39 = vadd.f32 %v1060_v32, %v702_v45  ;;  %v717_v47 = vadd.f32 %v1624_v60, %v2016_v51 }
 0x11c   : > { %v711_v40 = vpop.f32.mrf.mxu1  ;;  %v1070_v62 = vpop.f32.mrf.mxu0 }
 0x11d   : > { %1248 = vst [vmem:[%s2068_s8 + $0x80] sm:$0xff] %v1216_v37  ;;  %v1219_v41 = vmax.f32 %v1187_v38, 0.0  ;;  %v1186_v42 = vadd.f32 %v2061_v13, %v1147_v39  ;;  %v1150_v44 = vadd.f32 %v1676_v36, %v717_v47  ;;  %v712_v49 = vadd.f32 %v711_v40, %v2018_v53 }
 0x11e   : > { %v1627_v46 = vpop.f32.mrf.mxu1  ;;  %v1679_v48 = vpop.f32.mrf.mxu0 }
 0x11f   : > { %1251 = vst [vmem:[%s2068_s8 + $0x98] sm:$0xff] %v1219_v41  ;;  %v1218_v0 = vmax.f32 %v1186_v42, 0.0  ;;  %v1189_v10 = vadd.f32 %v2061_v13, %v1150_v44  ;;  %v1149_v11 = vadd.f32 %v1070_v62, %v712_v49  ;;  %v727_v51 = vadd.f32 %v1627_v46, %v2020_v55 }
 0x120   : > { %v721_v50 = vpop.f32.mrf.mxu1  ;;  %v1080_v12 = vpop.f32.mrf.mxu0 }
 0x121   : > { %1250 = vst [vmem:[%s2068_s8 + $0x90] sm:$0xff] %v1218_v0  ;;  %v1221_v14 = vmax.f32 %v1189_v10, 0.0  ;;  %v1188_v2 = vadd.f32 %v2061_v13, %v1149_v11  ;;  %v1152_v15 = vadd.f32 %v1679_v48, %v727_v51  ;;  %v722_v53 = vadd.f32 %v721_v50, %v2024_v57 }
 0x122   : > { %v1630_v16 = vpop.f32.mrf.mxu1  ;;  %v1682_v52 = vpop.f32.mrf.mxu0 }
 0x123   : > { %1253 = vst [vmem:[%s2068_s8 + $0xa8] sm:$0xff] %v1221_v14  ;;  %v1220_v17 = vmax.f32 %v1188_v2, 0.0  ;;  %v1191_v18 = vadd.f32 %v2061_v13, %v1152_v15  ;;  %v1151_v4 = vadd.f32 %v1080_v12, %v722_v53  ;;  %v737_v55 = vadd.f32 %v1630_v16, %v2028_v59 }
 0x124   : > { %v731_v19 = vpop.f32.mrf.mxu1  ;;  %v1090_v20 = vpop.f32.mrf.mxu0 }
 0x125   : > { %1252 = vst [vmem:[%s2068_s8 + $0xa0] sm:$0xff] %v1220_v17  ;;  %v1223_v54 = vmax.f32 %v1191_v18, 0.0  ;;  %v1190_v21 = vadd.f32 %v2061_v13, %v1151_v4  ;;  %v1154_v22 = vadd.f32 %v1682_v52, %v737_v55  ;;  %v732_v57 = vadd.f32 %v731_v19, %v2032_v61 }
 0x126   : > { %v1633_v6 = vpop.f32.mrf.mxu1  ;;  %v1685_v23 = vpop.f32.mrf.mxu0 }
 0x127   : > { %1255 = vst [vmem:[%s2068_s8 + $0xb8] sm:$0xff] %v1223_v54  ;;  %v1222_v24 = vmax.f32 %v1190_v21, 0.0  ;;  %v1193_v25 = vadd.f32 %v2061_v13, %v1154_v22  ;;  %v1153_v56 = vadd.f32 %v1090_v20, %v732_v57  ;;  %v747_v59 = vadd.f32 %v1633_v6, %v2036_v63 }
 0x128   : > { %v741_v26 = vpop.f32.mrf.mxu1  ;;  %v1100_v8 = vpop.f32.mrf.mxu0 }
 0x129   : > { %1254 = vst [vmem:[%s2068_s8 + $0xb0] sm:$0xff] %v1222_v24  ;;  %v1225_v27 = vmax.f32 %v1193_v25, 0.0  ;;  %v1192_v28 = vadd.f32 %v2061_v13, %v1153_v56  ;;  %v1156_v29 = vadd.f32 %v1685_v23, %v747_v59  ;;  %v742_v61 = vadd.f32 %v741_v26, %v2040_v1 }
 0x12a   : > { %v1636_v30 = vpop.f32.mrf.mxu1  ;;  %v1688_v58 = vpop.f32.mrf.mxu0 }
 0x12b   : > { %1257 = vst [vmem:[%s2068_s8 + $0xc8] sm:$0xff] %v1225_v27  ;;  %v1224_v43 = vmax.f32 %v1192_v28, 0.0  ;;  %v1195_v31 = vadd.f32 %v2061_v13, %v1156_v29  ;;  %v1155_v32 = vadd.f32 %v1100_v8, %v742_v61  ;;  %v757_v63 = vadd.f32 %v1636_v30, %v2044_v3 }
 0x12c   : > { %v751_v33 = vpop.f32.mrf.mxu1  ;;  %v1110_v34 = vpop.f32.mrf.mxu0 }
 0x12d   : > { %1256 = vst [vmem:[%s2068_s8 + $0xc0] sm:$0xff] %v1224_v43  ;;  %v1227_v35 = vmax.f32 %v1195_v31, 0.0  ;;  %v1194_v45 = vadd.f32 %v2061_v13, %v1155_v32  ;;  %v1158_v60 = vadd.f32 %v1688_v58, %v757_v63  ;;  %v752_v1 = vadd.f32 %v751_v33, %v2048_v5 }
 0x12e   : > { %v1639_v36 = vpop.f32.mrf.mxu1  ;;  %v1691_v37 = vpop.f32.mrf.mxu0 }
 0x12f   : > { %1259 = vst [vmem:[%s2068_s8 + $0xd8] sm:$0xff] %v1227_v35  ;;  %v1226_v38 = vmax.f32 %v1194_v45, 0.0  ;;  %v1197_v39 = vadd.f32 %v2061_v13, %v1158_v60  ;;  %v1157_v47 = vadd.f32 %v1110_v34, %v752_v1  ;;  %v767_v3 = vadd.f32 %v1639_v36, %v2052_v7 }
 0x130   : > { %v761_v40 = vpop.f32.mrf.mxu1  ;;  %v1120_v44 = vpop.f32.mrf.mxu0 }
 0x131   : > { %1258 = vst [vmem:[%s2068_s8 + $0xd0] sm:$0xff] %v1226_v38  ;;  %v1229_v62 = vmax.f32 %v1197_v39, 0.0  ;;  %v1196_v41 = vadd.f32 %v2061_v13, %v1157_v47  ;;  %v1160_v42 = vadd.f32 %v1691_v37, %v767_v3  ;;  %v762_v5 = vadd.f32 %v761_v40, %v2056_v9 }
 0x133   : > { %1261 = vst [vmem:[%s2068_s8 + $0xe8] sm:$0xff] %v1229_v62  ;;  %v1228_v49 = vmax.f32 %v1196_v41, 0.0  ;;  %v1199_v46 = vadd.f32 %v2061_v13, %v1160_v42  ;;  %v1159_v48 = vadd.f32 %v1120_v44, %v762_v5 }
 0x135   : > { %1260 = vst [vmem:[%s2068_s8 + $0xe0] sm:$0xff] %v1228_v49  ;;  %v1231_v0 = vmax.f32 %v1199_v46, 0.0  ;;  %v1198_v10 = vadd.f32 %v2061_v13, %v1159_v48 }
 0x137   : > { %1263 = vst [vmem:[%s2068_s8 + $0xf8] sm:$0xff] %v1231_v0  ;;  %v1230_v7 = vmax.f32 %v1198_v10, 0.0 }
 0x139   : > { %1262 = vst [vmem:[%s2068_s8 + $0xf0] sm:$0xff] %v1230_v7 }
 0x13a PF: > { %s13_s12 = sadd.s32 1, %s1711_s12  }
 0x13b   : > { %p10_p4 = scmp.ge.s32.totalorder %s13_s12, 4  }
 0x13d   :  { %12 = sbr.rel (!%p10_p4) target bundleno = 1 (0x1), region = 64 }

// kernel: _features_and_gate.8
= control target key start
LH: loop header
LB: loop body
LE: loop exit
PB: predicated region body
PF: predicated region fallthrough
CT: control target
= control target key end

     0   :  { %s259_s6 = smov 0   ;;  %s276_s0 = inlined_call_operand.vmem [shape: f32[2,8,4,256], index: 0, kind: input, shape index: {}]   ;;  %s277_s1 = inlined_call_operand.vmem [shape: f32[2,4,4,128], index: 1, kind: output, shape index: {}]  }
   0x1 LB: > { %s220_s7 = sadd.s32 4294967295, %s247_s6   ;;  %p224_p0 = scmp.ge.s32.totalorder %s247_s6, 1  ;;  %s247_s6 = sphi %s259_s6, %s11_s6  }
   0x2   : > { %p87_p1 = scmp.lt.s32.totalorder %s247_s6, 3 }
   0x4   : > { %p88_p2 = pnand %p224_p0, %p87_p1 }
   0x5   : > { %p107_p3 = scmp.lt.s32.totalorder (!%p88_p2), %s220_s7, 1 }
   0x6   : > { %91 = sbr.rel (%p88_p2) target bundleno = 25 (0x19), region = 24 }
   0xb   : > { %s279_s7 = smov (!%p107_p3, %s220_s7), 1 }
   0xc   : > { %s231_s8 = sshll.u32 %s279_s7, 6  ;;  %s232_s12 = sshll.u32 %s279_s7, 4 }
   0xd   : > { %s111_s11 = scalar_lea.vmem %s276_s0, %s231_s8  ;;  %s116_s15 = scalar_lea.vmem %s277_s1, %s232_s12 }
   0xe   : > { %v117_v0 = vld [vmem:[%s111_s11] sm:$0xff]  ;;  %v118_v1 = vld [vmem:[%s111_s11 + $0x8] sm:$0xff]  ;;  %v119_v2 = vld [vmem:[%s111_s11 + $0x10] sm:$0xff] }
   0xf   : > { %v133_v3 = vrot.slane %v117_v0, 4  ;;  %v134_v4 = vrot.slane %v118_v1, 4  ;;  %v120_v5 = vld [vmem:[%s111_s11 + $0x18] sm:$0xff]  ;;  %v135_v6 = vrot.slane %v119_v2, 4  ;;  %v121_v7 = vld [vmem:[%s111_s11 + $0x20] sm:$0xff]  ;;  %v122_v8 = vld [vmem:[%s111_s11 + $0x28] sm:$0xff] }
  0x10   : > { %v136_v9 = vrot.slane %v120_v5, 4  ;;  %v137_v10 = vrot.slane %v121_v7, 4  ;;  %v138_v11 = vrot.slane %v122_v8, 4  ;;  %v123_v12 = vld [vmem:[%s111_s11 + $0x30] sm:$0xff]  ;;  %v124_v13 = vld [vmem:[%s111_s11 + $0x38] sm:$0xff] }
  0x11   : > { %v149_v14 = vmax.f32 %v117_v0, %v133_v3  ;;  %v150_v15 = vmax.f32 %v118_v1, %v134_v4  ;;  %v151_v16 = vmax.f32 %v119_v2, %v135_v6  ;;  %v139_v17 = vrot.slane %v123_v12, 4 }
  0x12   : > { %v152_v18 = vmax.f32 %v120_v5, %v136_v9  ;;  %v153_v19 = vmax.f32 %v121_v7, %v137_v10  ;;  %v154_v20 = vmax.f32 %v122_v8, %v138_v11  ;;  %v140_v21 = vrot.slane %v124_v13, 4 }
  0x13   : > { %v157_v22 = vmax.f32 %v149_v14, %v150_v15  ;;  %v155_v23 = vmax.f32 %v123_v12, %v139_v17 }
  0x14   : > { %v158_v24 = vmax.f32 %v151_v16, %v152_v18  ;;  %v159_v25 = vmax.f32 %v153_v19, %v154_v20  ;;  %v156_v26 = vmax.f32 %v124_v13, %v140_v21 }
  0x15   : > { %161 = vst [vmem:[%s116_s15] sm:$0xf] %v157_v22 }
  0x16   : > { %162 = vst [vmem:[%s116_s15 + $0x4] sm:$0xf] %v158_v24  ;;  %163 = vst [vmem:[%s116_s15 + $0x8] sm:$0xf] %v159_v25  ;;  %v160_v27 = vmax.f32 %v155_v23, %v156_v26 }
  0x18   : > { %164 = vst [vmem:[%s116_s15 + $0xc] sm:$0xf] %v160_v27 }
  0x19 PF: > { %s11_s6 = sadd.s32 1, %s247_s6  }
  0x1a   : > { %p8_p4 = scmp.ge.s32.totalorder %s11_s6, 4  }
  0x1c   :  { %10 = sbr.rel (!%p8_p4) target bundleno = 1 (0x1), region = 54 }

// kernel: _features_and_gate.7
= control target key start
LH: loop header
LB: loop body
LE: loop exit
PB: predicated region body
PF: predicated region fallthrough
CT: control target
= control target key end

     0   :  { %s880_s12 = smov 0   ;;  %s994_s0 = inlined_call_operand.vmem [shape: f32[2,80,48], index: 0, kind: input, shape index: {}]   ;;  %s995_s1 = inlined_call_operand.vmem [shape: f32[3,48,128], index: 1, kind: input, shape index: {}]   ;;  %s996_s2 = inlined_call_operand.vmem [shape: f32[1,128], index: 2, kind: input, shape index: {}]   ;;  %s997_s3 = inlined_call_operand.vmem [shape: f32[2,64,128], index: 3, kind: output, shape index: {}]  }
   0x1 LB: > { %s669_s13 = sadd.s32 4294967295, %s858_s12   ;;  %p673_p0 = scmp.ge.s32.totalorder %s858_s12, 1  ;;  %s858_s12 = sphi %s880_s12, %s13_s12  }
   0x2   : > { %p137_p1 = scmp.lt.s32.totalorder %s858_s12, 3 }
   0x4   : > { %p138_p2 = pnand %p673_p0, %p137_p1 }
   0x5   : > { %p161_p3 = scmp.lt.s32.totalorder (!%p138_p2), %s669_s13, 1 }
   0x6   : > { %141 = sbr.rel (%p138_p2) target bundleno = 251 (0xfb), region = 32 }
   0xb   : > { %v682_v0 = vld [vmem:[%s995_s1 + $0x58] sm:$0xff]  ;;  %v184_v1 = vld [vmem:[%s995_s1 + $0x28] sm:$0xff]  ;;  %v681_v2 = vld [vmem:[%s995_s1 + $0x50] sm:$0xff]  ;;  %s999_s13 = smov (!%p161_p3, %s669_s13), 1  ;;  %vm193_vm0 = vcmask 392192  }
   0xc   : > { %759 = vmatprep.subr.mxu0 %v682_v0  ;;  %783 = vmatprep.subr.mxu1 %v184_v1  ;;  %v183_v3 = vld [vmem:[%s995_s1 + $0x20] sm:$0xff]  ;;  %v680_v4 = vld [vmem:[%s995_s1 + $0x48] sm:$0xff]  ;;  %v182_v5 = vld [vmem:[%s995_s1 + $0x18] sm:$0xff]  ;;  %s843_s30 = smul.u32 80, %s999_s13  ;;  %s716_s4 = sshll.u32 %s999_s13, 6 }
   0xd   : > { %760 = vmatpush3.msra.mxu0 %v682_v0  ;;  %784 = vmatpush3.msra.mxu1 %v184_v1  ;;  %v679_v6 = vld [vmem:[%s995_s1 + $0x40] sm:$0xff]  ;;  %v181_v7 = vld [vmem:[%s995_s1 + $0x10] sm:$0xff]  ;;  %v678_v8 = vld [vmem:[%s995_s1 + $0x38] sm:$0xff]  ;;  %s170_s7 = scalar_lea.vmem %s997_s3, %s716_s4 }
   0xe   : > { %761 = vmatprep.subr.mxu0 %v681_v2  ;;  %785 = vmatprep.subr.mxu1 %v183_v3  ;;  %v180_v9 = vld [vmem:[%s995_s1 + $0x8] sm:$0xff]  ;;  %s924_s10 = scalar_lea.vmem %s994_s0, %s843_s30  ;;  %v677_v10 = vld [vmem:[%s995_s1 + $0x30] sm:$0xff]  ;;  %v179_v11 = vld [vmem:[%s995_s1] sm:$0xff] }
   0xf   : > { %762 = vmatpush3.msra.mxu0 %v681_v2  ;;  %786 = vmatpush3.msra.mxu1 %v183_v3  ;;  %v172_v12 = vld [vmem:[%s924_s10 + $0x8] sm:$0xff]  ;;  %v171_v13 = vld [vmem:[%s924_s10] sm:$0xff]  ;;  %v173_v14 = vld [vmem:[%s924_s10 + $0x10] sm:$0xff] }
  0x10   : > { %763 = vmatprep.subr.mxu0 %v680_v4  ;;  %787 = vmatprep.subr.mxu1 %v182_v5  ;;  %v704_v15 = vld [vmem:[%s995_s1 + $0x88] sm:$0xff]  ;;  %v174_v16 = vld [vmem:[%s924_s10 + $0x18] sm:$0xff]  ;;  %v703_v17 = vld [vmem:[%s995_s1 + $0x80] sm:$0xff] }
  0x11   : > { %764 = vmatpush3.msra.mxu0 %v680_v4  ;;  %788 = vmatpush3.msra.mxu1 %v182_v5  ;;  %v175_v18 = vld [vmem:[%s924_s10 + $0x20] sm:$0xff]  ;;  %v702_v19 = vld [vmem:[%s995_s1 + $0x78] sm:$0xff]  ;;  %v176_v20 = vld [vmem:[%s924_s10 + $0x28] sm:$0xff] }
  0x12   : > { %765 = vmatprep.subr.mxu0 %v679_v6  ;;  %789 = vmatprep.subr.mxu1 %v181_v7  ;;  %v177_v21 = vld [vmem:[%s924_s10 + $0x30] sm:$0xff]  ;;  %v178_v23 = vld [vmem:[%s924_s10 + $0x38] sm:$0xff]  ;;  %v700_v24 = vld [vmem:[%s995_s1 + $0x68] sm:$0xff] }
  0x13   : > { %766 = vmatpush3.msra.mxu0 %v679_v6  ;;  %790 = vmatpush3.msra.mxu1 %v181_v7  ;;  %v701_v22 = vld [vmem:[%s995_s1 + $0x70] sm:$0xff]  ;;  %v185_v25 = vld [vmem:[%s924_s10 + $0x40] sm:$0xff]  ;;  %v438_v27 = vld [vmem:[%s924_s10 + $0x48] sm:$0xff] }
  0x14   : > { %767 = vmatprep.subr.mxu0 %v678_v8  ;;  %791 = vmatprep.subr.mxu1 %v180_v9  ;;  %v699_v26 = vld [vmem:[%s995_s1 + $0x60] sm:$0xff] }
  0x15   : > { %768 = vmatpush3.msra.mxu0 %v678_v8  ;;  %792 = vmatpush3.msra.mxu1 %v180_v9  ;;  %v713_v47 = vld [vmem:[%s996_s2] ss:$0 sm:$0xff] }
  0x16   : > { %769 = vmatprep.subr.mxu0 %v677_v10  ;;  %793 = vmatprep.subr.mxu1 %v179_v11 }
  0x17   : > { %770 = vmatpush3.msra.mxu0 %v677_v10  ;;  %771 = vmatprep.mubr.msk.f32.mxu0 %vm193_vm0, %v172_v12 }
  0x18   : > { %794 = vmatpush3.msra.mxu1 %v179_v11  ;;  %795 = vmatprep.mubr.msk.f32.mxu1 %vm193_vm0, %v171_v13 }
  0x19   : > { %772 = vmatmul.mubr.msk.f32.vlgmr.msra.gmra.mxu0 %vm193_vm0, %v173_v14  ;;  %796 = vmatmul.mubr.msk.f32.vlgmr.msra.gmra.mxu1 %vm193_vm0, %v172_v12 }
  0x1a   : > { %807 = vmatprep.subr.mxu0 %v704_v15  ;;  %831 = vmatprep.subr.mxu1 %v704_v15 }
  0x1b   : > { %808 = vmatpush3.msra.mxu0 %v704_v15  ;;  %837 = vmatpush3.msra.mxu1 %v704_v15 }
  0x1c   : > { %774 = vmatprep.mubr.msk.f32.mxu0 %vm193_vm0, %v174_v16  ;;  %798 = vmatprep.mubr.msk.f32.mxu1 %vm193_vm0, %v173_v14 }
  0x1d   : > { %809 = vmatprep.subr.mxu0 %v703_v17  ;;  %832 = vmatprep.subr.mxu1 %v703_v17 }
  0x1e   : > { %775 = vmatmul.mubr.msk.f32.gmra.mxu0 %vm193_vm0, %v175_v18  ;;  %799 = vmatmul.mubr.msk.f32.gmra.mxu1 %vm193_vm0, %v174_v16 }
  0x1f   : > { %810 = vmatpush3.msra.mxu0 %v703_v17  ;;  %838 = vmatpush3.msra.mxu1 %v703_v17 }
  0x20   : > { %811 = vmatprep.subr.mxu0 %v702_v19  ;;  %833 = vmatprep.subr.mxu1 %v702_v19 }
  0x21   : > { %777 = vmatprep.mubr.msk.f32.mxu0 %vm193_vm0, %v176_v20  ;;  %801 = vmatprep.mubr.msk.f32.mxu1 %vm193_vm0, %v175_v18 }
  0x22   : > { %812 = vmatpush3.msra.mxu0 %v702_v19  ;;  %839 = vmatpush3.msra.mxu1 %v702_v19 }
  0x23   : > { %778 = vmatmul.mubr.msk.f32.gmra.mxu0 %vm193_vm0, %v177_v21  ;;  %802 = vmatmul.mubr.msk.f32.gmra.mxu1 %vm193_vm0, %v176_v20 }
  0x24   : > { %813 = vmatprep.subr.mxu0 %v701_v22  ;;  %834 = vmatprep.subr.mxu1 %v701_v22 }
  0x25   : > { %814 = vmatpush3.msra.mxu0 %v701_v22  ;;  %840 = vmatpush3.msra.mxu1 %v701_v22 }
  0x26   : > { %780 = vmatprep.mubr.msk.f32.mxu0 %vm193_vm0, %v178_v23  ;;  %804 = vmatprep.mubr.msk.f32.mxu1 %vm193_vm0, %v177_v21 }
  0x27   : > { %815 = vmatprep.subr.mxu0 %v700_v24  ;;  %835 = vmatprep.subr.mxu1 %v700_v24 }
  0x28   : > { %781 = vmatmul.mubr.msk.f32.gmra.mxu0 %vm193_vm0, %v185_v25  ;;  %805 = vmatmul.mubr.msk.f32.gmra.mxu1 %vm193_vm0, %v178_v23 }
  0x29   : > { %816 = vmatpush3.msra.mxu0 %v700_v24  ;;  %841 = vmatpush3.msra.mxu1 %v700_v24 }
  0x2a   : > { %817 = vmatprep.subr.mxu0 %v699_v26  ;;  %836 = vmatprep.subr.mxu1 %v699_v26 }
  0x2b   : > { %818 = vmatpush3.msra.mxu0 %v699_v26  ;;  %842 = vmatpush3.msra.mxu1 %v699_v26 }
  0x2c   : > { %819 = vmatprep.mubr.msk.f32.mxu0 %vm193_vm0, %v173_v14  ;;  %825 = vmatprep.mubr.msk.f32.mxu1 %vm193_vm0, %v177_v21 }
  0x2d   : > { %820 = vmatmul.mubr.msk.f32.vlgmr.msra.gmra.mxu0 %vm193_vm0, %v174_v16  ;;  %826 = vmatmul.mubr.msk.f32.vlgmr.msra.gmra.mxu1 %vm193_vm0, %v178_v23 }
  0x2e   : > { %822 = vmatprep.mubr.msk.f32.mxu0 %vm193_vm0, %v175_v18  ;;  %828 = vmatprep.mubr.msk.f32.mxu1 %vm193_vm0, %v185_v25 }
  0x31   : > { %823 = vmatmul.mubr.msk.f32.gmra.mxu0 %vm193_vm0, %v176_v20  ;;  %829 = vmatmul.mubr.msk.f32.gmra.mxu1 %vm193_vm0, %v438_v27 }
  0xd9   : > { %v773_v28 = vpop.f32.mrf.mxu0  ;;  %v797_v29 = vpop.f32.mrf.mxu1 }
  0xda   : > { %v398_v44 = vadd.f32 %v797_v29, %v773_v28 }
  0xdb   : > { %v284_v30 = vpop.f32.mrf.mxu0  ;;  %v392_v31 = vpop.f32.mrf.mxu1 }
  0xdc   : > { %v393_v49 = vadd.f32 %v392_v31, %v284_v30 }
  0xde   : > { %v776_v32 = vpop.f32.mrf.mxu0  ;;  %v800_v33 = vpop.f32.mrf.mxu1 }
  0xdf   : > { %v408_v59 = vadd.f32 %v800_v33, %v776_v32 }
  0xe0   : > { %v294_v34 = vpop.f32.mrf.mxu0  ;;  %v402_v35 = vpop.f32.mrf.mxu1 }
  0xe1   : > { %v403_v60 = vadd.f32 %v402_v35, %v294_v34 }
  0xe3   : > { %v779_v36 = vpop.f32.mrf.mxu0  ;;  %v803_v37 = vpop.f32.mrf.mxu1 }
  0xe4   : > { %v418_v45 = vadd.f32 %v803_v37, %v779_v36 }
  0xe5   : > { %v304_v38 = vpop.f32.mrf.mxu0  ;;  %v412_v39 = vpop.f32.mrf.mxu1 }
  0xe6   : > { %v413_v50 = vadd.f32 %v412_v39, %v304_v38 }
  0xe8   : > { %v782_v40 = vpop.f32.mrf.mxu0  ;;  %v806_v41 = vpop.f32.mrf.mxu1 }
  0xe9   : > { %v428_v61 = vadd.f32 %v806_v41, %v782_v40 }
  0xea   : > { %v314_v42 = vpop.f32.mrf.mxu0  ;;  %v422_v43 = vpop.f32.mrf.mxu1 }
  0xeb   : > { %v423_v62 = vadd.f32 %v422_v43, %v314_v42 }
  0xed   : > { %v821_v46 = vpop.f32.mrf.mxu0  ;;  %v827_v48 = vpop.f32.mrf.mxu1 }
  0xee   : > { %v576_v51 = vadd.f32 %v821_v46, %v398_v44  ;;  %v580_v52 = vadd.f32 %v827_v48, %v418_v45 }
  0xef   : > { %v536_v53 = vpop.f32.mrf.mxu0  ;;  %v556_v54 = vpop.f32.mrf.mxu1 }
  0xf0   : > { %v591_v55 = vadd.f32 %v713_v47, %v576_v51  ;;  %v595_v56 = vadd.f32 %v713_v47, %v580_v52  ;;  %v575_v57 = vadd.f32 %v536_v53, %v393_v49  ;;  %v579_v58 = vadd.f32 %v556_v54, %v413_v50 }
  0xf1   : > { %v824_v63 = vpop.f32.mrf.mxu0  ;;  %v830_v0 = vpop.f32.mrf.mxu1 }
  0xf2   : > { %v599_v1 = vmax.f32 %v591_v55, 0.0  ;;  %v603_v2 = vmax.f32 %v595_v56, 0.0  ;;  %v590_v3 = vadd.f32 %v713_v47, %v575_v57  ;;  %v594_v4 = vadd.f32 %v713_v47, %v579_v58 }
  0xf3   : > { %v578_v5 = vadd.f32 %v824_v63, %v408_v59  ;;  %v582_v6 = vadd.f32 %v830_v0, %v428_v61  ;;  %v546_v7 = vpop.f32.mrf.mxu0  ;;  %v566_v8 = vpop.f32.mrf.mxu1 }
  0xf4   : > { %607 = vst [vmem:[%s170_s7 + $0x8] sm:$0xff] %v599_v1  ;;  %611 = vst [vmem:[%s170_s7 + $0x28] sm:$0xff] %v603_v2  ;;  %v598_v9 = vmax.f32 %v590_v3, 0.0  ;;  %v602_v10 = vmax.f32 %v594_v4, 0.0  ;;  %v577_v11 = vadd.f32 %v546_v7, %v403_v60  ;;  %v581_v12 = vadd.f32 %v566_v8, %v423_v62 }
  0xf5   : > { %v593_v13 = vadd.f32 %v713_v47, %v578_v5  ;;  %v597_v14 = vadd.f32 %v713_v47, %v582_v6 }
  0xf6   : > { %606 = vst [vmem:[%s170_s7] sm:$0xff] %v598_v9  ;;  %610 = vst [vmem:[%s170_s7 + $0x20] sm:$0xff] %v602_v10  ;;  %v592_v15 = vadd.f32 %v713_v47, %v577_v11  ;;  %v596_v16 = vadd.f32 %v713_v47, %v581_v12 }
  0xf7   : > { %v601_v17 = vmax.f32 %v593_v13, 0.0  ;;  %v605_v18 = vmax.f32 %v597_v14, 0.0 }
  0xf8   : > { %v600_v19 = vmax.f32 %v592_v15, 0.0  ;;  %v604_v20 = vmax.f32 %v596_v16, 0.0 }
  0xf9   : > { %609 = vst [vmem:[%s170_s7 + $0x18] sm:$0xff] %v601_v17  ;;  %613 = vst [vmem:[%s170_s7 + $0x38] sm:$0xff] %v605_v18 }
  0xfa   : > { %608 = vst [vmem:[%s170_s7 + $0x10] sm:$0xff] %v600_v19  ;;  %612 = vst [vmem:[%s170_s7 + $0x30] sm:$0xff] %v604_v20 }
  0xfb PF: > { %s13_s12 = sadd.s32 1, %s858_s12  }
  0xfc   : > { %p10_p4 = scmp.ge.s32.totalorder %s13_s12, 4  }
  0xfe   :  { %12 = sbr.rel (!%p10_p4) target bundleno = 1 (0x1), region = 64 }

// kernel: _features_and_gate.9
= control target key start
LH: loop header
LB: loop body
LE: loop exit
PB: predicated region body
PF: predicated region fallthrough
CT: control target
= control target key end

     0   :  { %vm614_vm0 = vmmov 0   ;;  %s1001_s1 = inlined_call_operand.vmem [shape: f32[512,128], index: 1, kind: input, shape index: {}]   ;;  %s1002_s0 = inlined_call_operand.vmem [shape: f32[8,512], index: 0, kind: input, shape index: {}]   ;;  %s1003_s3 = inlined_call_operand.vmem [shape: f32[128,128], index: 3, kind: input, shape index: {}]   ;;  %s1004_s5 = inlined_call_operand.vmem [shape: f32[128,128], index: 5, kind: input, shape index: {}]   ;;  %s1005_s2 = inlined_call_operand.vmem [shape: f32[1,128], index: 2, kind: input, shape index: {}]   ;;  %s1006_s4 = inlined_call_operand.vmem [shape: f32[1,128], index: 4, kind: input, shape index: {}]   ;;  %s1007_s6 = inlined_call_operand.vmem [shape: f32[1,128], index: 6, kind: input, shape index: {}]   ;;  %s1008_s7 = inlined_call_operand.vmem [shape: f32[8,128], index: 7, kind: output, shape index: {}]  }
   0x1   :  { %v61_v0 = vld [vmem:[%s1001_s1 + $0xf8] sm:$0xff]  ;;  %v60_v4 = vld [vmem:[%s1001_s1 + $0xf0] sm:$0xff]  ;;  %v59_v8 = vld [vmem:[%s1001_s1 + $0xe8] sm:$0xff] }
   0x2   :  { %v93_v1 = vld [vmem:[%s1001_s1 + $0x1f8] sm:$0xff]  ;;  %437 = vmatprep.subr.mxu0 %v61_v0  ;;  %v92_v5 = vld [vmem:[%s1001_s1 + $0x1f0] sm:$0xff]  ;;  %v91_v9 = vld [vmem:[%s1001_s1 + $0x1e8] sm:$0xff] }
   0x3   :  { %v45_v2 = vld [vmem:[%s1001_s1 + $0x78] sm:$0xff]  ;;  %472 = vmatprep.subr.mxu1 %v93_v1  ;;  %v44_v6 = vld [vmem:[%s1001_s1 + $0x70] sm:$0xff]  ;;  %v43_v10 = vld [vmem:[%s1001_s1 + $0x68] sm:$0xff] }
   0x4   :  { %v77_v3 = vld [vmem:[%s1001_s1 + $0x178] sm:$0xff]  ;;  %438 = vmatpush3.msra.mxu0 %v45_v2  ;;  %v76_v7 = vld [vmem:[%s1001_s1 + $0x170] sm:$0xff]  ;;  %v75_v11 = vld [vmem:[%s1001_s1 + $0x168] sm:$0xff] }
   0x5   :  { %473 = vmatpush3.msra.mxu1 %v77_v3  ;;  %439 = vmatprep.subr.mxu0 %v60_v4  ;;  %v58_v12 = vld [vmem:[%s1001_s1 + $0xe0] sm:$0xff]  ;;  %v57_v16 = vld [vmem:[%s1001_s1 + $0xd8] sm:$0xff]  ;;  %v56_v20 = vld [vmem:[%s1001_s1 + $0xd0] sm:$0xff] }
   0x6   :  { %474 = vmatprep.subr.mxu1 %v92_v5  ;;  %440 = vmatpush3.msra.mxu0 %v44_v6  ;;  %v90_v13 = vld [vmem:[%s1001_s1 + $0x1e0] sm:$0xff]  ;;  %v89_v17 = vld [vmem:[%s1001_s1 + $0x1d8] sm:$0xff]  ;;  %v88_v21 = vld [vmem:[%s1001_s1 + $0x1d0] sm:$0xff]  ;;  %v613_v5 = vmov 0.0  }
   0x7   :  { %475 = vmatpush3.msra.mxu1 %v76_v7  ;;  %441 = vmatprep.subr.mxu0 %v59_v8  ;;  %v42_v14 = vld [vmem:[%s1001_s1 + $0x60] sm:$0xff]  ;;  %v41_v18 = vld [vmem:[%s1001_s1 + $0x58] sm:$0xff]  ;;  %v40_v22 = vld [vmem:[%s1001_s1 + $0x50] sm:$0xff] }
   0x8   :  { %476 = vmatprep.subr.mxu1 %v91_v9  ;;  %v74_v15 = vld [vmem:[%s1001_s1 + $0x160] sm:$0xff]  ;;  %442 = vmatpush3.msra.mxu0 %v43_v10  ;;  %v73_v19 = vld [vmem:[%s1001_s1 + $0x158] sm:$0xff]  ;;  %v72_v23 = vld [vmem:[%s1001_s1 + $0x150] sm:$0xff] }
   0x9   :  { %477 = vmatpush3.msra.mxu1 %v75_v11  ;;  %443 = vmatprep.subr.mxu0 %v58_v12  ;;  %v55_v24 = vld [vmem:[%s1001_s1 + $0xc8] sm:$0xff]  ;;  %v54_v28 = vld [vmem:[%s1001_s1 + $0xc0] sm:$0xff]  ;;  %v53_v32 = vld [vmem:[%s1001_s1 + $0xb8] sm:$0xff] }
   0xa   :  { %478 = vmatprep.subr.mxu1 %v90_v13  ;;  %444 = vmatpush3.msra.mxu0 %v42_v14  ;;  %v87_v25 = vld [vmem:[%s1001_s1 + $0x1c8] sm:$0xff]  ;;  %v86_v29 = vld [vmem:[%s1001_s1 + $0x1c0] sm:$0xff]  ;;  %v85_v33 = vld [vmem:[%s1001_s1 + $0x1b8] sm:$0xff] }
   0xb   :  { %479 = vmatpush3.msra.mxu1 %v74_v15  ;;  %445 = vmatprep.subr.mxu0 %v57_v16  ;;  %v39_v26 = vld [vmem:[%s1001_s1 + $0x48] sm:$0xff]  ;;  %v38_v30 = vld [vmem:[%s1001_s1 + $0x40] sm:$0xff]  ;;  %v37_v34 = vld [vmem:[%s1001_s1 + $0x38] sm:$0xff] }
   0xc   :  { %480 = vmatprep.subr.mxu1 %v89_v17  ;;  %446 = vmatpush3.msra.mxu0 %v41_v18  ;;  %v71_v27 = vld [vmem:[%s1001_s1 + $0x148] sm:$0xff]  ;;  %v70_v31 = vld [vmem:[%s1001_s1 + $0x140] sm:$0xff]  ;;  %v69_v35 = vld [vmem:[%s1001_s1 + $0x138] sm:$0xff] }
   0xd   :  { %481 = vmatpush3.msra.mxu1 %v73_v19  ;;  %447 = vmatprep.subr.mxu0 %v56_v20  ;;  %v52_v36 = vld [vmem:[%s1001_s1 + $0xb0] sm:$0xff]  ;;  %v51_v40 = vld [vmem:[%s1001_s1 + $0xa8] sm:$0xff]  ;;  %v50_v44 = vld [vmem:[%s1001_s1 + $0xa0] sm:$0xff] }
   0xe   :  { %482 = vmatprep.subr.mxu1 %v88_v21  ;;  %448 = vmatpush3.msra.mxu0 %v40_v22  ;;  %v84_v37 = vld [vmem:[%s1001_s1 + $0x1b0] sm:$0xff]  ;;  %v83_v41 = vld [vmem:[%s1001_s1 + $0x1a8] sm:$0xff]  ;;  %v82_v45 = vld [vmem:[%s1001_s1 + $0x1a0] sm:$0xff] }
   0xf   :  { %483 = vmatpush3.msra.mxu1 %v72_v23  ;;  %449 = vmatprep.subr.mxu0 %v55_v24  ;;  %v36_v38 = vld [vmem:[%s1001_s1 + $0x30] sm:$0xff]  ;;  %v35_v42 = vld [vmem:[%s1001_s1 + $0x28] sm:$0xff]  ;;  %v34_v46 = vld [vmem:[%s1001_s1 + $0x20] sm:$0xff] }
  0x10   :  { %484 = vmatprep.subr.mxu1 %v87_v25  ;;  %450 = vmatpush3.msra.mxu0 %v39_v26  ;;  %v68_v39 = vld [vmem:[%s1001_s1 + $0x130] sm:$0xff]  ;;  %v67_v43 = vld [vmem:[%s1001_s1 + $0x128] sm:$0xff]  ;;  %v66_v47 = vld [vmem:[%s1001_s1 + $0x120] sm:$0xff] }
  0x11   :  { %485 = vmatpush3.msra.mxu1 %v71_v27  ;;  %451 = vmatprep.subr.mxu0 %v54_v28  ;;  %v49_v48 = vld [vmem:[%s1001_s1 + $0x98] sm:$0xff]  ;;  %v48_v52 = vld [vmem:[%s1001_s1 + $0x90] sm:$0xff]  ;;  %v47_v56 = vld [vmem:[%s1001_s1 + $0x88] sm:$0xff] }
  0x12   :  { %486 = vmatprep.subr.mxu1 %v86_v29  ;;  %452 = vmatpush3.msra.mxu0 %v38_v30  ;;  %v81_v49 = vld [vmem:[%s1001_s1 + $0x198] sm:$0xff]  ;;  %v80_v53 = vld [vmem:[%s1001_s1 + $0x190] sm:$0xff]  ;;  %v79_v57 = vld [vmem:[%s1001_s1 + $0x188] sm:$0xff] }
  0x13   :  { %487 = vmatpush3.msra.mxu1 %v70_v31  ;;  %453 = vmatprep.subr.mxu0 %v53_v32  ;;  %v33_v50 = vld [vmem:[%s1001_s1 + $0x18] sm:$0xff]  ;;  %v32_v54 = vld [vmem:[%s1001_s1 + $0x10] sm:$0xff]  ;;  %v31_v58 = vld [vmem:[%s1001_s1 + $0x8] sm:$0xff] }
  0x14   :  { %488 = vmatprep.subr.mxu1 %v85_v33  ;;  %454 = vmatpush3.msra.mxu0 %v37_v34  ;;  %v65_v51 = vld [vmem:[%s1001_s1 + $0x118] sm:$0xff]  ;;  %v64_v55 = vld [vmem:[%s1001_s1 + $0x110] sm:$0xff]  ;;  %v63_v59 = vld [vmem:[%s1001_s1 + $0x108] sm:$0xff] }
  0x15   :  { %489 = vmatpush3.msra.mxu1 %v69_v35  ;;  %455 = vmatprep.subr.mxu0 %v52_v36  ;;  %v46_v60 = vld [vmem:[%s1001_s1 + $0x80] sm:$0xff]  ;;  %v27_v63 = vld [vmem:[%s1002_s0 + $0x8] sm:$0xff]  ;;  %v29_v1 = vld [vmem:[%s1002_s0 + $0x18] sm:$0xff] }
  0x16   :  { %490 = vmatprep.subr.mxu1 %v84_v37  ;;  %456 = vmatpush3.msra.mxu0 %v36_v38  ;;  %v78_v61 = vld [vmem:[%s1001_s1 + $0x180] sm:$0xff]  ;;  %v28_v3 = vld [vmem:[%s1002_s0 + $0x10] sm:$0xff]  ;;  %v257_v4 = vld [vmem:[%s1003_s3 + $0x78] sm:$0xff] }
  0x17   :  { %491 = vmatpush3.msra.mxu1 %v68_v39  ;;  %457 = vmatprep.subr.mxu0 %v51_v40  ;;  %v30_v62 = vld [vmem:[%s1001_s1] sm:$0xff]  ;;  %v256_v6 = vld [vmem:[%s1003_s3 + $0x70] sm:$0xff]  ;;  %v255_v7 = vld [vmem:[%s1003_s3 + $0x68] sm:$0xff] }
  0x18   :  { %492 = vmatprep.subr.mxu1 %v83_v41  ;;  %458 = vmatpush3.msra.mxu0 %v35_v42  ;;  %v62_v0 = vld [vmem:[%s1001_s1 + $0x100] sm:$0xff]  ;;  %v253_v9 = vld [vmem:[%s1003_s3 + $0x58] sm:$0xff]  ;;  %v252_v10 = vld [vmem:[%s1003_s3 + $0x50] sm:$0xff] }
  0x19   :  { %493 = vmatpush3.msra.mxu1 %v67_v43  ;;  %459 = vmatprep.subr.mxu0 %v50_v44  ;;  %v26_v2 = vld [vmem:[%s1002_s0] sm:$0xff]  ;;  %v251_v11 = vld [vmem:[%s1003_s3 + $0x48] sm:$0xff]  ;;  %v249_v13 = vld [vmem:[%s1003_s3 + $0x38] sm:$0xff] }
  0x1a   :  { %494 = vmatprep.subr.mxu1 %v82_v45  ;;  %460 = vmatpush3.msra.mxu0 %v34_v46  ;;  %v254_v8 = vld [vmem:[%s1003_s3 + $0x60] sm:$0xff]  ;;  %v248_v14 = vld [vmem:[%s1003_s3 + $0x30] sm:$0xff]  ;;  %v247_v15 = vld [vmem:[%s1003_s3 + $0x28] sm:$0xff] }
  0x1b   :  { %495 = vmatpush3.msra.mxu1 %v66_v47  ;;  %461 = vmatprep.subr.mxu0 %v49_v48  ;;  %v250_v12 = vld [vmem:[%s1003_s3 + $0x40] sm:$0xff]  ;;  %v245_v17 = vld [vmem:[%s1003_s3 + $0x18] sm:$0xff]  ;;  %v244_v18 = vld [vmem:[%s1003_s3 + $0x10] sm:$0xff] }
  0x1c   :  { %496 = vmatprep.subr.mxu1 %v81_v49  ;;  %462 = vmatpush3.msra.mxu0 %v33_v50  ;;  %v246_v16 = vld [vmem:[%s1003_s3 + $0x20] sm:$0xff]  ;;  %v243_v19 = vld [vmem:[%s1003_s3 + $0x8] sm:$0xff]  ;;  %v351_v21 = vld [vmem:[%s1004_s5 + $0x78] sm:$0xff] }
  0x1d   :  { %497 = vmatpush3.msra.mxu1 %v65_v51  ;;  %463 = vmatprep.subr.mxu0 %v48_v52  ;;  %v242_v20 = vld [vmem:[%s1003_s3] sm:$0xff]  ;;  %v350_v22 = vld [vmem:[%s1004_s5 + $0x70] sm:$0xff]  ;;  %v349_v23 = vld [vmem:[%s1004_s5 + $0x68] sm:$0xff] }
  0x1e   :  { %498 = vmatprep.subr.mxu1 %v80_v53  ;;  %464 = vmatpush3.msra.mxu0 %v32_v54  ;;  %v348_v24 = vld [vmem:[%s1004_s5 + $0x60] sm:$0xff]  ;;  %v347_v25 = vld [vmem:[%s1004_s5 + $0x58] sm:$0xff]  ;;  %v346_v26 = vld [vmem:[%s1004_s5 + $0x50] sm:$0xff] }
  0x1f   :  { %499 = vmatpush3.msra.mxu1 %v64_v55  ;;  %465 = vmatprep.subr.mxu0 %v47_v56  ;;  %v345_v27 = vld [vmem:[%s1004_s5 + $0x48] sm:$0xff]  ;;  %v344_v28 = vld [vmem:[%s1004_s5 + $0x40] sm:$0xff]  ;;  %v343_v29 = vld [vmem:[%s1004_s5 + $0x38] sm:$0xff] }
  0x20   :  { %500 = vmatprep.subr.mxu1 %v79_v57  ;;  %466 = vmatpush3.msra.mxu0 %v31_v58  ;;  %v342_v30 = vld [vmem:[%s1004_s5 + $0x30] sm:$0xff]  ;;  %v341_v31 = vld [vmem:[%s1004_s5 + $0x28] sm:$0xff]  ;;  %v340_v32 = vld [vmem:[%s1004_s5 + $0x20] sm:$0xff] }
  0x21   :  { %501 = vmatpush3.msra.mxu1 %v63_v59  ;;  %467 = vmatprep.subr.mxu0 %v46_v60  ;;  %v339_v33 = vld [vmem:[%s1004_s5 + $0x18] sm:$0xff]  ;;  %v434_v36 = vld [vmem:[%s1005_s2] ss:$0 sm:$0xff]  ;;  %v338_v44 = vld [vmem:[%s1004_s5 + $0x10] sm:$0xff] }
  0x22   :  { %502 = vmatprep.subr.mxu1 %v78_v61  ;;  %468 = vmatpush3.msra.mxu0 %v30_v62  ;;  %v337_v45 = vld [vmem:[%s1004_s5 + $0x8] sm:$0xff]  ;;  %v336_v46 = vld [vmem:[%s1004_s5] sm:$0xff] }
  0x23   :  { %165 = vmatprep.mubr.f32.mxu0 %v27_v63  ;;  %503 = vmatpush3.msra.mxu1 %v62_v0  ;;  %v435_v47 = vld [vmem:[%s1006_s4] ss:$0 sm:$0xff] }
  0x24   :  { %235 = vmatprep.mubr.f32.mxu1 %v29_v1  ;;  %166 = vmatmul.mubr.f32.vlgmr.msra.gmra.mxu0 %v26_v2  ;;  %v436_v52 = vld [vmem:[%s1007_s6] ss:$0 sm:$0xff] }
  0x25   :  { %236 = vmatmul.mubr.f32.vlgmr.msra.gmra.mxu1 %v28_v3  ;;  %541 = vmatprep.subr.mxu0 %v613_v5 }
  0x26   :  { %576 = vmatprep.subr.mxu1 %v613_v5  ;;  %542 = vmatpush3.msra.mxu0 %v257_v4 }
  0x27   :  { %543 = vmatprep.subr.mxu0 %v613_v5  ;;  %573 = vmatprep.mubr.msk.f32.mxu0 %vm614_vm0, %v613_v5 }
  0x28   :  { %544 = vmatpush3.msra.mxu0 %v256_v6  ;;  %608 = vmatprep.mubr.msk.f32.mxu1 %vm614_vm0, %v613_v5 }
  0x29   :  { %545 = vmatprep.subr.mxu0 %v613_v5  ;;  %577 = vmatpush3.msra.mxu1 %v351_v21 }
  0x2a   :  { %546 = vmatpush3.msra.mxu0 %v255_v7  ;;  %578 = vmatprep.subr.mxu1 %v613_v5 }
  0x2b   :  { %547 = vmatprep.subr.mxu0 %v613_v5  ;;  %579 = vmatpush3.msra.mxu1 %v350_v22 }
  0x2c   :  { %548 = vmatpush3.msra.mxu0 %v254_v8  ;;  %580 = vmatprep.subr.mxu1 %v613_v5 }
  0x2d   :  { %549 = vmatprep.subr.mxu0 %v613_v5  ;;  %581 = vmatpush3.msra.mxu1 %v349_v23 }
  0x2e   :  { %550 = vmatpush3.msra.mxu0 %v253_v9  ;;  %582 = vmatprep.subr.mxu1 %v613_v5 }
  0x2f   :  { %551 = vmatprep.subr.mxu0 %v613_v5  ;;  %583 = vmatpush3.msra.mxu1 %v348_v24 }
  0x30   :  { %552 = vmatpush3.msra.mxu0 %v252_v10  ;;  %584 = vmatprep.subr.mxu1 %v613_v5 }
  0x31   :  { %553 = vmatprep.subr.mxu0 %v613_v5  ;;  %585 = vmatpush3.msra.mxu1 %v347_v25 }
  0x32   :  { %554 = vmatpush3.msra.mxu0 %v251_v11  ;;  %586 = vmatprep.subr.mxu1 %v613_v5 }
  0x33   :  { %555 = vmatprep.subr.mxu0 %v613_v5  ;;  %587 = vmatpush3.msra.mxu1 %v346_v26 }
  0x34   :  { %556 = vmatpush3.msra.mxu0 %v250_v12  ;;  %588 = vmatprep.subr.mxu1 %v613_v5 }
  0x35   :  { %557 = vmatprep.subr.mxu0 %v613_v5  ;;  %589 = vmatpush3.msra.mxu1 %v345_v27 }
  0x36   :  { %558 = vmatpush3.msra.mxu0 %v249_v13  ;;  %590 = vmatprep.subr.mxu1 %v613_v5 }
  0x37   :  { %559 = vmatprep.subr.mxu0 %v613_v5  ;;  %591 = vmatpush3.msra.mxu1 %v344_v28 }
  0x38   :  { %560 = vmatpush3.msra.mxu0 %v248_v14  ;;  %592 = vmatprep.subr.mxu1 %v613_v5 }
  0x39   :  { %561 = vmatprep.subr.mxu0 %v613_v5  ;;  %593 = vmatpush3.msra.mxu1 %v343_v29 }
  0x3a   :  { %562 = vmatpush3.msra.mxu0 %v247_v15  ;;  %594 = vmatprep.subr.mxu1 %v613_v5 }
  0x3b   :  { %563 = vmatprep.subr.mxu0 %v613_v5  ;;  %595 = vmatpush3.msra.mxu1 %v342_v30 }
  0x3c   :  { %564 = vmatpush3.msra.mxu0 %v246_v16  ;;  %596 = vmatprep.subr.mxu1 %v613_v5 }
  0x3d   :  { %565 = vmatprep.subr.mxu0 %v613_v5  ;;  %597 = vmatpush3.msra.mxu1 %v341_v31 }
  0x3e   :  { %566 = vmatpush3.msra.mxu0 %v245_v17  ;;  %598 = vmatprep.subr.mxu1 %v613_v5 }
  0x3f   :  { %567 = vmatprep.subr.mxu0 %v613_v5  ;;  %599 = vmatpush3.msra.mxu1 %v340_v32 }
  0x40   :  { %568 = vmatpush3.msra.mxu0 %v244_v18  ;;  %600 = vmatprep.subr.mxu1 %v613_v5 }
  0x41   :  { %569 = vmatprep.subr.mxu0 %v613_v5  ;;  %601 = vmatpush3.msra.mxu1 %v339_v33 }
  0x42   :  { %570 = vmatpush3.msra.mxu0 %v243_v19  ;;  %602 = vmatprep.subr.mxu1 %v613_v5 }
  0x43   :  { %571 = vmatprep.subr.mxu0 %v613_v5  ;;  %603 = vmatpush3.msra.mxu1 %v338_v44 }
  0x44   :  { %572 = vmatpush3.msra.mxu0 %v242_v20  ;;  %604 = vmatprep.subr.mxu1 %v613_v5 }
  0x45   :  { %605 = vmatpush3.msra.mxu1 %v337_v45 }
  0x46   :  { %606 = vmatprep.subr.mxu1 %v613_v5 }
  0x47   :  { %607 = vmatpush3.msra.mxu1 %v336_v46 }
  0xe4   :  { %v469_v34 = vpop.f32.mrf.mxu0 }
  0xe5   :  { %v504_v35 = vpop.f32.mrf.mxu1 }
  0xe6   :  { %v470_v37 = vpop.f32.mrf.mxu0 }
  0xe7   :  { %v505_v38 = vpop.f32.mrf.mxu1  ;;  %v471_v39 = vadd.f32 %v470_v37, %v469_v34 }
  0xe8   :  { %v506_v41 = vadd.f32 %v505_v38, %v504_v35 }
  0xe9   :  { %v168_v40 = vadd.f32 %v471_v39, %v434_v36 }
  0xeb   :  { %v238_v42 = vadd.f32 %v506_v41, %v168_v40 }
  0xed   :  { %v241_v43 = vmax.f32 %v238_v42, 0.0 }
  0xef   :  { %574 = vmatmul.mubr.f32.vlgmr.msra.gmra.mxu0 %v241_v43 }
 0x1af   :  { %v331_v48 = vpop.f32.mrf.mxu0 }
 0x1b0   :  { %v332_v49 = vadd.f32 %v435_v47, %v331_v48 }
 0x1b1   :  { %v575_v50 = vpop.f32.mrf.mxu0 }
 0x1b2   :  { %v335_v51 = vmax.f32 %v332_v49, 0.0 }
 0x1b4   :  { %609 = vmatmul.mubr.f32.vlgmr.msra.gmra.mxu1 %v335_v51 }
 0x274   :  { %v425_v53 = vpop.f32.mrf.mxu1 }
 0x275   :  { %v426_v54 = vadd.f32 %v436_v52, %v425_v53 }
 0x276   :  { %v610_v55 = vpop.f32.mrf.mxu1 }
 0x277   :  { %429 = vst [vmem:[%s1008_s7] sm:$0xff] %v426_v54 }

</bundles_post_ra>
